<compile_context>
chip_gen: v5e
topology: v5e:2x2
jax: 0.10.0
libtpu: 0.0.40
codegen_flags: <defaults>
</compile_context>

<pallas_src>
import functools

import jax
import jax.numpy as jnp
from jax.experimental import pallas as pl
from jax.experimental.pallas import tpu as pltpu


def shake_block_kernel(xpad_ref, w1_ref, b1_ref, w2_ref, b2_ref, out_ref,
                       pad_ref, *, nb, H, W, C):
    M = nb * H * W
    x = xpad_ref[...]                          # (nb, H+2, W+2, C) f32, zero-padded
    h = jnp.maximum(x, 0.0)                    # leading ReLU (zero padding unaffected)

    # Residual = pre-ReLU interior of the padded input (identity shortcut).
    res = x[:, 1:H + 1, 1:W + 1, :].reshape(M, C)

    # ---- conv1 (both branches fused along Cout) ------------------------------
    # im2col: 9 shifted patches concatenated along channels -> (M, 9*C).
    cols1 = [h[:, ky:ky + H, kx:kx + W, :].reshape(M, C)
             for ky in range(3) for kx in range(3)]
    lhs1 = jnp.concatenate(cols1, axis=1).astype(jnp.bfloat16)
    # BN1 scale is folded into w1; bias added here.  Columns [:C] = branch1,
    # columns [C:] = branch2.
    y = jnp.dot(lhs1, w1_ref[...], preferred_element_type=jnp.float32) + b1_ref[...]
    y = jnp.maximum(y, 0.0)                    # (M, 2C)

    # ---- zero-padded intermediate for conv2 (single fused buffer) ------------
    pad_ref[...] = jnp.zeros((nb, H + 2, W + 2, 2 * C), jnp.float32)
    pad_ref[:, 1:H + 1, 1:W + 1, :] = y.reshape(nb, H, W, 2 * C)
    y_pad = pad_ref[...]

    # ---- conv2 (branches fused along the contraction dimension) --------------
    cols2 = [y_pad[:, ky:ky + H, kx:kx + W, :].reshape(M, 2 * C)
             for ky in range(3) for kx in range(3)]
    lhs2 = jnp.concatenate(cols2, axis=1).astype(jnp.bfloat16)       # (M, 18*C)
    # w2 is block-structured so a single dot = conv2(branch1) + conv2(branch2),
    # with BN2 scales already folded into the weights.
    z = jnp.dot(lhs2, w2_ref[...], preferred_element_type=jnp.float32)

    # Eval-mode ShakeShake (alpha = 0.5) + identity shortcut.
    # b2_ref already holds 0.5 * (bias2_branch1 + bias2_branch2).
    out_ref[...] = 0.5 * z + b2_ref[...] + res


def shake_block_nhwc(x, params, nb=None):
    """x: (N, H, W, C) float32; returns (N, H, W, C) float32 (eval-mode forward)."""
    N, H, W, C = x.shape
    if nb is None:
        # Biggest divisor of N that keeps the matmul M dimension at a sane size.
        nb = 1
        for d in range(N, 0, -1):
            if N % d == 0 and d * H * W <= 2048:
                nb = d
                break
    x_pad = jnp.pad(x, ((0, 0), (1, 1), (1, 1), (0, 0)))

    def fold(w, s):                            # fold BN scale into conv weight (HWIO)
        return w * s[None, None, None, :]

    # conv1: branches concatenated along Cout -> (9*C, 2*C), bf16 for the MXU.
    w1 = jnp.concatenate([fold(params["w1a"], params["s1a"]),
                          fold(params["w1b"], params["s1b"])],
                         axis=3).reshape(9 * C, 2 * C).astype(jnp.bfloat16)
    b1 = jnp.concatenate([params["b1a"], params["b1b"]]).reshape(1, 2 * C)
    # conv2: branches stacked block-wise along Cin -> (18*C, C); one matmul then
    # produces conv2a(y_a) + conv2b(y_b) directly.
    w2 = jnp.concatenate([fold(params["w2a"], params["s2a"]),
                          fold(params["w2b"], params["s2b"])],
                         axis=2).reshape(9 * 2 * C, C).astype(jnp.bfloat16)
    b2 = (0.5 * (params["b2a"] + params["b2b"])).reshape(1, C)

    m_total = N * H * W
    flops = 2 * m_total * (9 * C) * (2 * C) + 2 * m_total * (18 * C) * C
    bytes_accessed = (int(x_pad.size) * 4 + m_total * C * 4
                      + (int(w1.size) + int(w2.size)) * 2
                      + (int(b1.size) + int(b2.size)) * 4)

    kernel = functools.partial(shake_block_kernel, nb=nb, H=H, W=W, C=C)
    out2d = pl.pallas_call(
        kernel,
        out_shape=jax.ShapeDtypeStruct((N * H * W, C), jnp.float32),
        grid_spec=pltpu.PrefetchScalarGridSpec(
            num_scalar_prefetch=0,
            grid=(N // nb,),
            in_specs=[
                pl.BlockSpec((nb, H + 2, W + 2, C), lambda n: (n, 0, 0, 0)),
                pl.BlockSpec((9 * C, 2 * C), lambda n: (0, 0)),
                pl.BlockSpec((1, 2 * C), lambda n: (0, 0)),
                pl.BlockSpec((18 * C, C), lambda n: (0, 0)),
                pl.BlockSpec((1, C), lambda n: (0, 0)),
            ],
            out_specs=pl.BlockSpec((nb * H * W, C), lambda n: (n, 0)),
            scratch_shapes=[pltpu.VMEM((nb, H + 2, W + 2, 2 * C), jnp.float32)],
        ),
        compiler_params=pltpu.CompilerParams(
            # Independent batch blocks -> shardable across TensorCores (v7x).
            dimension_semantics=("parallel",)),
        cost_estimate=pl.CostEstimate(flops=flops, transcendentals=0,
                                      bytes_accessed=bytes_accessed),
    )(x_pad, w1, b1, w2, b2)
    return out2d.reshape(N, H, W, C)


# ---------------- pure-JAX reference (for correctness check) ----------------
def _ref_branch(x, w1, s1, b1, w2, s2, b2):
    h = jax.nn.relu(x)
    h = jax.lax.conv_general_dilated(h, w1, (1, 1), "SAME",
                                     dimension_numbers=("NHWC", "HWIO", "NHWC"))
    h = h * s1 + b1
    h = jax.nn.relu(h)
    h = jax.lax.conv_general_dilated(h, w2, (1, 1), "SAME",
                                     dimension_numbers=("NHWC", "HWIO", "NHWC"))
    return h * s2 + b2


def ref_forward(x, p):
    h1 = _ref_branch(x, p["w1a"], p["s1a"], p["b1a"], p["w2a"], p["s2a"], p["b2a"])
    h2 = _ref_branch(x, p["w1b"], p["s1b"], p["b1b"], p["w2b"], p["s2b"], p["b2b"])
    return 0.5 * h1 + 0.5 * h2 + x


# ---------------- deterministic parameter init ----------------
def init_params(key, C):
    p = {}
    eps = 1e-5
    fan_in = 3 * 3 * C
    for br in ("a", "b"):
        for layer in ("1", "2"):
            key, kw, kg, kb, km, kv = jax.random.split(key, 6)
            w = jax.random.normal(kw, (3, 3, C, C), jnp.float32) / jnp.sqrt(fan_in)
            gamma = jax.random.uniform(kg, (C,), dtype=jnp.float32,
                                       minval=0.8, maxval=1.2)
            beta = 0.1 * jax.random.normal(kb, (C,), jnp.float32)
            mean = 0.1 * jax.random.normal(km, (C,), jnp.float32)
            var = jax.random.uniform(kv, (C,), dtype=jnp.float32,
                                     minval=0.5, maxval=1.5)
            scale = gamma / jnp.sqrt(var + eps)
            bias = beta - mean * scale
            p[f"w{layer}{br}"] = w
            p[f"s{layer}{br}"] = scale
            p[f"b{layer}{br}"] = bias
    return p


if __name__ == "__main__":
    key = jax.random.PRNGKey(0)
    kx, kp = jax.random.split(key)

    # ShakeBlock(in_ch=16, out_ch=16, stride=1) — equal_io, identity shortcut.
    N, C, H, W = 2, 16, 8, 8
    x_nchw = jax.random.normal(kx, (N, C, H, W), jnp.float32)   # PyTorch NCHW input
    params = init_params(kp, C)

    x_nhwc = jnp.transpose(x_nchw, (0, 2, 3, 1))
    out_nhwc = shake_block_nhwc(x_nhwc, params)
    out_nchw = jnp.transpose(out_nhwc, (0, 3, 1, 2))
    jax.block_until_ready(out_nchw)

    ref_nchw = jnp.transpose(ref_forward(x_nhwc, params), (0, 3, 1, 2))
    err = float(jnp.max(jnp.abs(out_nchw - ref_nchw)))
    # bf16 matmul inputs (f32 accumulation) trade ~1e-2 abs error for MXU rate;
    # structural bugs would produce O(1) errors and still trip this assert.
    assert err < 1e-1, f"max abs err {err}"
    print("KERNEL_OK")
</pallas_src>

<mosaic_0001>
module attributes {stable_mosaic.version = 11 : i64} {
  func.func @shake_block_kernel(%arg0: i32, %arg1: memref<2x10x10x16xf32, #tpu.memory_space<vmem>>, %arg2: memref<144x32xbf16, #tpu.memory_space<vmem>>, %arg3: memref<1x32xf32, #tpu.memory_space<vmem>>, %arg4: memref<288x16xbf16, #tpu.memory_space<vmem>>, %arg5: memref<1x16xf32, #tpu.memory_space<vmem>>, %arg6: memref<128x16xf32, #tpu.memory_space<vmem>>, %arg7: memref<2x10x10x32xf32, #tpu.memory_space<vmem>>) attributes {dimension_semantics = [#tpu.dimension_semantics<parallel>], iteration_bounds = array<i64: 1>, scalar_prefetch = 0 : i64, scratch_operands = 1 : i64, tpu.core_type = #tpu.core_type<tc>, window_params = [{transform_indices = @transform_0, window_bounds = array<i64: 2, 10, 10, 16>}, {pipeline_mode = #tpu.pipeline_mode<synchronous>, transform_indices = @transform_1, window_bounds = array<i64: 144, 32>}, {pipeline_mode = #tpu.pipeline_mode<synchronous>, transform_indices = @transform_2, window_bounds = array<i64: 1, 32>}, {pipeline_mode = #tpu.pipeline_mode<synchronous>, transform_indices = @transform_3, window_bounds = array<i64: 288, 16>}, {pipeline_mode = #tpu.pipeline_mode<synchronous>, transform_indices = @transform_4, window_bounds = array<i64: 1, 16>}, {transform_indices = @transform_5, window_bounds = array<i64: 128, 16>}]} {
    %c0 = arith.constant 0 : index
    %c0_0 = arith.constant 0 : index
    %c0_1 = arith.constant 0 : index
    %c0_2 = arith.constant 0 : index
    %0 = vector.load %arg1[%c0, %c0_0, %c0_1, %c0_2] : memref<2x10x10x16xf32, #tpu.memory_space<vmem>>, vector<2x10x10x16xf32>
    %cst = arith.constant 0.000000e+00 : f32
    %1 = vector.broadcast %cst : f32 to vector<2x10x10x16xf32>
    %2 = arith.maximumf %0, %1 : vector<2x10x10x16xf32>
    %3 = vector.extract_strided_slice %0 {offsets = [0, 1, 1, 0], sizes = [2, 8, 8, 16], strides = [1, 1, 1, 1]} : vector<2x10x10x16xf32> to vector<2x8x8x16xf32>
    %4 = vector.shape_cast %3 : vector<2x8x8x16xf32> to vector<128x16xf32>
    %5 = vector.extract_strided_slice %2 {offsets = [0, 0, 0, 0], sizes = [2, 8, 8, 16], strides = [1, 1, 1, 1]} : vector<2x10x10x16xf32> to vector<2x8x8x16xf32>
    %6 = vector.shape_cast %5 : vector<2x8x8x16xf32> to vector<128x16xf32>
    %7 = vector.extract_strided_slice %2 {offsets = [0, 0, 1, 0], sizes = [2, 8, 8, 16], strides = [1, 1, 1, 1]} : vector<2x10x10x16xf32> to vector<2x8x8x16xf32>
    %8 = vector.shape_cast %7 : vector<2x8x8x16xf32> to vector<128x16xf32>
    %9 = vector.extract_strided_slice %2 {offsets = [0, 0, 2, 0], sizes = [2, 8, 8, 16], strides = [1, 1, 1, 1]} : vector<2x10x10x16xf32> to vector<2x8x8x16xf32>
    %10 = vector.shape_cast %9 : vector<2x8x8x16xf32> to vector<128x16xf32>
    %11 = vector.extract_strided_slice %2 {offsets = [0, 1, 0, 0], sizes = [2, 8, 8, 16], strides = [1, 1, 1, 1]} : vector<2x10x10x16xf32> to vector<2x8x8x16xf32>
    %12 = vector.shape_cast %11 : vector<2x8x8x16xf32> to vector<128x16xf32>
    %13 = vector.extract_strided_slice %2 {offsets = [0, 1, 1, 0], sizes = [2, 8, 8, 16], strides = [1, 1, 1, 1]} : vector<2x10x10x16xf32> to vector<2x8x8x16xf32>
    %14 = vector.shape_cast %13 : vector<2x8x8x16xf32> to vector<128x16xf32>
    %15 = vector.extract_strided_slice %2 {offsets = [0, 1, 2, 0], sizes = [2, 8, 8, 16], strides = [1, 1, 1, 1]} : vector<2x10x10x16xf32> to vector<2x8x8x16xf32>
    %16 = vector.shape_cast %15 : vector<2x8x8x16xf32> to vector<128x16xf32>
    %17 = vector.extract_strided_slice %2 {offsets = [0, 2, 0, 0], sizes = [2, 8, 8, 16], strides = [1, 1, 1, 1]} : vector<2x10x10x16xf32> to vector<2x8x8x16xf32>
    %18 = vector.shape_cast %17 : vector<2x8x8x16xf32> to vector<128x16xf32>
    %19 = vector.extract_strided_slice %2 {offsets = [0, 2, 1, 0], sizes = [2, 8, 8, 16], strides = [1, 1, 1, 1]} : vector<2x10x10x16xf32> to vector<2x8x8x16xf32>
    %20 = vector.shape_cast %19 : vector<2x8x8x16xf32> to vector<128x16xf32>
    %21 = vector.extract_strided_slice %2 {offsets = [0, 2, 2, 0], sizes = [2, 8, 8, 16], strides = [1, 1, 1, 1]} : vector<2x10x10x16xf32> to vector<2x8x8x16xf32>
    %22 = vector.shape_cast %21 : vector<2x8x8x16xf32> to vector<128x16xf32>
    %23 = tpu.concatenate %6, %8, %10, %12, %14, %16, %18, %20, %22 in 1 : vector<128x16xf32>, vector<128x16xf32>, vector<128x16xf32>, vector<128x16xf32>, vector<128x16xf32>, vector<128x16xf32>, vector<128x16xf32>, vector<128x16xf32>, vector<128x16xf32> -> vector<128x144xf32>
    %24 = arith.truncf %23 : vector<128x144xf32> to vector<128x144xbf16>
    %c0_3 = arith.constant 0 : index
    %c0_4 = arith.constant 0 : index
    %25 = vector.load %arg2[%c0_3, %c0_4] : memref<144x32xbf16, #tpu.memory_space<vmem>>, vector<144x32xbf16>
    %cst_5 = arith.constant dense<0.000000e+00> : vector<128x32xf32>
    %26 = tpu.matmul %24, %25, %cst_5 {dimension_numbers = #tpu.dot_dimension_numbers<[1], [0], [0], [1], [0, 0, 1, 1], [], []>} : vector<128x144xbf16>, vector<144x32xbf16>, vector<128x32xf32> -> vector<128x32xf32>
    %c0_6 = arith.constant 0 : index
    %c0_7 = arith.constant 0 : index
    %27 = vector.load %arg3[%c0_6, %c0_7] : memref<1x32xf32, #tpu.memory_space<vmem>>, vector<1x32xf32>
    %28 = vector.broadcast %27 : vector<1x32xf32> to vector<128x32xf32>
    %29 = arith.addf %26, %28 : vector<128x32xf32>
    %cst_8 = arith.constant 0.000000e+00 : f32
    %30 = vector.broadcast %cst_8 : f32 to vector<128x32xf32>
    %31 = arith.maximumf %29, %30 : vector<128x32xf32>
    %cst_9 = arith.constant 0.000000e+00 : f32
    %32 = vector.broadcast %cst_9 : f32 to vector<2x10x10x32xf32>
    %c0_10 = arith.constant 0 : index
    %c0_11 = arith.constant 0 : index
    %c0_12 = arith.constant 0 : index
    %c0_13 = arith.constant 0 : index
    %33 = vector.load %arg7[%c0_10, %c0_11, %c0_12, %c0_13] : memref<2x10x10x32xf32, #tpu.memory_space<vmem>>, vector<2x10x10x32xf32>
    tpu.vector_store %arg7[%c0_10, %c0_11, %c0_12, %c0_13], %32 {strides = array<i32>} : memref<2x10x10x32xf32, #tpu.memory_space<vmem>>, vector<2x10x10x32xf32>,
    %34 = vector.shape_cast %31 : vector<128x32xf32> to vector<2x8x8x32xf32>
    %c0_14 = arith.constant 0 : index
    %c1 = arith.constant 1 : index
    %c1_15 = arith.constant 1 : index
    %c0_16 = arith.constant 0 : index
    %35 = vector.load %arg7[%c0_14, %c1, %c1_15, %c0_16] : memref<2x10x10x32xf32, #tpu.memory_space<vmem>>, vector<2x8x8x32xf32>
    tpu.vector_store %arg7[%c0_14, %c1, %c1_15, %c0_16], %34 {strides = array<i32>} : memref<2x10x10x32xf32, #tpu.memory_space<vmem>>, vector<2x8x8x32xf32>,
    %c0_17 = arith.constant 0 : index
    %c0_18 = arith.constant 0 : index
    %c0_19 = arith.constant 0 : index
    %c0_20 = arith.constant 0 : index
    %36 = vector.load %arg7[%c0_17, %c0_18, %c0_19, %c0_20] : memref<2x10x10x32xf32, #tpu.memory_space<vmem>>, vector<2x10x10x32xf32>
    %37 = vector.extract_strided_slice %36 {offsets = [0, 0, 0, 0], sizes = [2, 8, 8, 32], strides = [1, 1, 1, 1]} : vector<2x10x10x32xf32> to vector<2x8x8x32xf32>
    %38 = vector.shape_cast %37 : vector<2x8x8x32xf32> to vector<128x32xf32>
    %39 = vector.extract_strided_slice %36 {offsets = [0, 0, 1, 0], sizes = [2, 8, 8, 32], strides = [1, 1, 1, 1]} : vector<2x10x10x32xf32> to vector<2x8x8x32xf32>
    %40 = vector.shape_cast %39 : vector<2x8x8x32xf32> to vector<128x32xf32>
    %41 = vector.extract_strided_slice %36 {offsets = [0, 0, 2, 0], sizes = [2, 8, 8, 32], strides = [1, 1, 1, 1]} : vector<2x10x10x32xf32> to vector<2x8x8x32xf32>
    %42 = vector.shape_cast %41 : vector<2x8x8x32xf32> to vector<128x32xf32>
    %43 = vector.extract_strided_slice %36 {offsets = [0, 1, 0, 0], sizes = [2, 8, 8, 32], strides = [1, 1, 1, 1]} : vector<2x10x10x32xf32> to vector<2x8x8x32xf32>
    %44 = vector.shape_cast %43 : vector<2x8x8x32xf32> to vector<128x32xf32>
    %45 = vector.extract_strided_slice %36 {offsets = [0, 1, 1, 0], sizes = [2, 8, 8, 32], strides = [1, 1, 1, 1]} : vector<2x10x10x32xf32> to vector<2x8x8x32xf32>
    %46 = vector.shape_cast %45 : vector<2x8x8x32xf32> to vector<128x32xf32>
    %47 = vector.extract_strided_slice %36 {offsets = [0, 1, 2, 0], sizes = [2, 8, 8, 32], strides = [1, 1, 1, 1]} : vector<2x10x10x32xf32> to vector<2x8x8x32xf32>
    %48 = vector.shape_cast %47 : vector<2x8x8x32xf32> to vector<128x32xf32>
    %49 = vector.extract_strided_slice %36 {offsets = [0, 2, 0, 0], sizes = [2, 8, 8, 32], strides = [1, 1, 1, 1]} : vector<2x10x10x32xf32> to vector<2x8x8x32xf32>
    %50 = vector.shape_cast %49 : vector<2x8x8x32xf32> to vector<128x32xf32>
    %51 = vector.extract_strided_slice %36 {offsets = [0, 2, 1, 0], sizes = [2, 8, 8, 32], strides = [1, 1, 1, 1]} : vector<2x10x10x32xf32> to vector<2x8x8x32xf32>
    %52 = vector.shape_cast %51 : vector<2x8x8x32xf32> to vector<128x32xf32>
    %53 = vector.extract_strided_slice %36 {offsets = [0, 2, 2, 0], sizes = [2, 8, 8, 32], strides = [1, 1, 1, 1]} : vector<2x10x10x32xf32> to vector<2x8x8x32xf32>
    %54 = vector.shape_cast %53 : vector<2x8x8x32xf32> to vector<128x32xf32>
    %55 = tpu.concatenate %38, %40, %42, %44, %46, %48, %50, %52, %54 in 1 : vector<128x32xf32>, vector<128x32xf32>, vector<128x32xf32>, vector<128x32xf32>, vector<128x32xf32>, vector<128x32xf32>, vector<128x32xf32>, vector<128x32xf32>, vector<128x32xf32> -> vector<128x288xf32>
    %56 = arith.truncf %55 : vector<128x288xf32> to vector<128x288xbf16>
    %c0_21 = arith.constant 0 : index
    %c0_22 = arith.constant 0 : index
    %57 = vector.load %arg4[%c0_21, %c0_22] : memref<288x16xbf16, #tpu.memory_space<vmem>>, vector<288x16xbf16>
    %cst_23 = arith.constant dense<0.000000e+00> : vector<128x16xf32>
    %58 = tpu.matmul %56, %57, %cst_23 {dimension_numbers = #tpu.dot_dimension_numbers<[1], [0], [0], [1], [0, 0, 1, 1], [], []>} : vector<128x288xbf16>, vector<288x16xbf16>, vector<128x16xf32> -> vector<128x16xf32>
    %cst_24 = arith.constant 5.000000e-01 : f32
    %59 = vector.broadcast %cst_24 : f32 to vector<128x16xf32>
    %60 = arith.mulf %59, %58 : vector<128x16xf32>
    %c0_25 = arith.constant 0 : index
    %c0_26 = arith.constant 0 : index
    %61 = vector.load %arg5[%c0_25, %c0_26] : memref<1x16xf32, #tpu.memory_space<vmem>>, vector<1x16xf32>
    %62 = vector.broadcast %61 : vector<1x16xf32> to vector<128x16xf32>
    %63 = arith.addf %60, %62 : vector<128x16xf32>
    %64 = arith.addf %63, %4 : vector<128x16xf32>
    %c0_27 = arith.constant 0 : index
    %c0_28 = arith.constant 0 : index
    %65 = vector.load %arg6[%c0_27, %c0_28] : memref<128x16xf32, #tpu.memory_space<vmem>>, vector<128x16xf32>
    tpu.vector_store %arg6[%c0_27, %c0_28], %64 {strides = array<i32>} : memref<128x16xf32, #tpu.memory_space<vmem>>, vector<128x16xf32>,
    return
  }
  func.func @transform_0(%arg0: i32) -> (i32, i32, i32, i32) {
    %c0_i32 = arith.constant 0 : i32
    %c0_i32_0 = arith.constant 0 : i32
    %c0_i32_1 = arith.constant 0 : i32
    %c0_i32_2 = arith.constant 0 : i32
    return %arg0, %c0_i32, %c0_i32_0, %c0_i32_1 : i32, i32, i32, i32
  }
  func.func @transform_1(%arg0: i32) -> (i32, i32) {
    %c0_i32 = arith.constant 0 : i32
    %c0_i32_0 = arith.constant 0 : i32
    %c0_i32_1 = arith.constant 0 : i32
    return %c0_i32, %c0_i32_0 : i32, i32
  }
  func.func @transform_2(%arg0: i32) -> (i32, i32) {
    %c0_i32 = arith.constant 0 : i32
    %c0_i32_0 = arith.constant 0 : i32
    %c0_i32_1 = arith.constant 0 : i32
    return %c0_i32, %c0_i32_0 : i32, i32
  }
  func.func @transform_3(%arg0: i32) -> (i32, i32) {
    %c0_i32 = arith.constant 0 : i32
    %c0_i32_0 = arith.constant 0 : i32
    %c0_i32_1 = arith.constant 0 : i32
    return %c0_i32, %c0_i32_0 : i32, i32
  }
  func.func @transform_4(%arg0: i32) -> (i32, i32) {
    %c0_i32 = arith.constant 0 : i32
    %c0_i32_0 = arith.constant 0 : i32
    %c0_i32_1 = arith.constant 0 : i32
    return %c0_i32, %c0_i32_0 : i32, i32
  }
  func.func @transform_5(%arg0: i32) -> (i32, i32) {
    %c0_i32 = arith.constant 0 : i32
    %c0_i32_0 = arith.constant 0 : i32
    return %arg0, %c0_i32 : i32, i32
  }
}

</mosaic_0001>

<bundles_post_ra>
// kernel: tpu_custom_call.1
= control target key start
LH: loop header
LB: loop body
LE: loop exit
PB: predicated region body
PF: predicated region fallthrough
CT: control target
= control target key end

     0   :  { %vm133_vm0 = vcmask 1046528   ;;  %s2861_s9 = smov 48   ;;  %vm278_vm1 = vcmask 1045504   ;;  %s2862_s10 = smov 16   ;;  %vm711_vm2 = vcmask 130048   ;;  %vm728_vm3 = vcmask 261120   ;;  %s4272_s0 = inlined_call_operand.vmem [shape: f32[2,10,10,16], index: 0, kind: input, shape index: {}]   ;;  %s4273_s1 = inlined_call_operand.vmem [shape: bf16[144,32], index: 1, kind: input, shape index: {}]   ;;  %s4274_s2 = inlined_call_operand.vmem [shape: f32[1,32], index: 2, kind: input, shape index: {}]   ;;  %s4275_s3 = inlined_call_operand.vmem [shape: bf16[288,16], index: 3, kind: input, shape index: {}]   ;;  %s4276_s4 = inlined_call_operand.vmem [shape: f32[1,16], index: 4, kind: input, shape index: {}]   ;;  %s4277_s5 = inlined_call_operand.vmem [shape: f32[128,16], index: 5, kind: output, shape index: {}]  }
   0x1   :  { %v23_v0 = vld [vmem:[%s4272_s0 + $0x10] sm:$0xff]  ;;  %v24_v1 = vld [vmem:[%s4272_s0 + $0x18] sm:$0x3]  ;;  %v25_v2 = vld [vmem:[%s4272_s0 + $0x20] sm:$0xff]  ;;  %s2863_s15 = smov 64   ;;  %s2864_s16 = smov 80  }
   0x2   :  { %v26_v3 = vld [vmem:[%s4272_s0 + $0x28] sm:$0x3]  ;;  %v2911_v4 = vmax.f32 %v23_v0, 0.0  ;;  %v64_v5 = vmax.f32 %v24_v1, 0.0  ;;  %v2913_v6 = vmax.f32 %v25_v2, 0.0  ;;  %v21_v8 = vld [vmem:[%s4272_s0] sm:$0xff] }
   0x3   :  { %v66_v7 = vmax.f32 %v26_v3, 0.0  ;;  %v22_v9 = vld [vmem:[%s4272_s0 + $0x8] sm:$0x3]  ;;  %v2923_v13 = vmax.f32 %v21_v8, 0.0  ;;  %v27_v17 = vld [vmem:[%s4272_s0 + $0x30] sm:$0xff]  ;;  %v29_v40 = vld [vmem:[%s4272_s0 + $0x40] sm:$0xff] }
   0x4   :  { %v233_v10 = vrot.slane %v2911_v4, 1  ;;  %v234_v11 = vrot.slane %v64_v5, 1  ;;  %v236_v12 = vrot.slane %v2913_v6, 1  ;;  %v62_v15 = vmax.f32 %v22_v9, 0.0  ;;  %v28_v18 = vld [vmem:[%s4272_s0 + $0x38] sm:$0x3] }
   0x5   :  { %v237_v14 = vrot.slane %v66_v7, 1  ;;  %v2317_v16 = vpack.i.bf16 %v2913_v6, %v2911_v4  ;;  %v230_v19 = vrot.slane %v2923_v13, 1  ;;  %v282_v23 = vrot.slane %v2911_v4, 2  ;;  %v30_v41 = vld [vmem:[%s4272_s0 + $0x48] sm:$0x3]  ;;  %s2865_s17 = smov 32  }
   0x6   :  { %v235_v20 = vsel %vm133_vm0, %v233_v10, %v234_v11  ;;  %v231_v21 = vrot.slane %v62_v15, 1  ;;  %v2938_v24 = vmax.f32 %v27_v17, 0.0  ;;  %v68_v25 = vmax.f32 %v28_v18, 0.0  ;;  %v31_v54 = vld [vmem:[%s4272_s0 + $0x50] sm:$0xff]  ;;  %v32_v55 = vld [vmem:[%s4272_s0 + $0x58] sm:$0x3] }
   0x7   :  { %2318 = vrot.lane.b32.xlu1 %v2317_v16, %s2861_s9  ;;  %v238_v22 = vsel %vm133_vm0, %v236_v12, %v237_v14  ;;  %v279_v27 = vrot.slane %v2923_v13, 2  ;;  %v280_v28 = vrot.slane %v62_v15, 2  ;;  %v283_v29 = vrot.slane %v64_v5, 2  ;;  %s2866_s22 = smov 96   ;;  %s2867_s23 = smov 112   ;;  %v35_v16 = vld [vmem:[%s4272_s0 + $0x70] sm:$0xff] }
   0x8   :  { %v232_v26 = vsel %vm133_vm0, %v230_v19, %v231_v21  ;;  %v2322_v31 = vpack.i.bf16 %v238_v22, %v235_v20  ;;  %v285_v32 = vrot.slane %v2913_v6, 2  ;;  %v286_v33 = vrot.slane %v66_v7, 2  ;;  %v33_v7 = vld [vmem:[%s4272_s0 + $0x60] sm:$0xff]  ;;  %v34_v14 = vld [vmem:[%s4272_s0 + $0x68] sm:$0x3] }
   0x9   :  { %v2307_v30 = vpack.i.bf16 %v235_v20, %v232_v26  ;;  %v239_v34 = vrot.slane %v2938_v24, 1  ;;  %v240_v35 = vrot.slane %v68_v25, 1  ;;  %v288_v36 = vrot.slane %v2938_v24, 2  ;;  %v36_v19 = vld [vmem:[%s4272_s0 + $0x78] sm:$0x3] }
   0xa   :  { %v289_v37 = vrot.slane %v68_v25, 2  ;;  %v281_v38 = vsel %vm278_vm1, %v279_v27, %v280_v28  ;;  %v284_v39 = vsel %vm278_vm1, %v282_v23, %v283_v29  ;;  %v2955_v42 = vsel %vm278_vm1, %v285_v32, %v286_v33 }
   0xb   :  { %2308 = vrot.lane.b32.xlu0 %v2307_v30, %s2862_s10  ;;  %v2327_v44 = vpack.i.bf16 %v2955_v42, %v284_v39  ;;  %v2312_v46 = vpack.i.bf16 %v284_v39, %v281_v38  ;;  %v241_v47 = vsel %vm133_vm0, %v239_v34, %v240_v35  ;;  %v2965_v48 = vmax.f32 %v29_v40, 0.0  ;;  %v37_v34 = vld [vmem:[%s4272_s0 + $0x80] sm:$0xff]  ;;  %v38_v35 = vld [vmem:[%s4272_s0 + $0x88] sm:$0x3] }
   0xc   :  { %v2958_v43 = vsel %vm278_vm1, %v288_v36, %v289_v37  ;;  %v70_v49 = vmax.f32 %v30_v41, 0.0  ;;  %v2342_v50 = vpack.i.bf16 %v241_v47, %v238_v22  ;;  %v2332_v53 = vpack.i.bf16 %v2938_v24, %v2913_v6 }
   0xd   :  { %v831_v45 = vpack.c.bf16 %v2958_v43, %v2955_v42  ;;  %2328 = vrot.lane.b32.xlu2 %v2327_v44, %s2864_s16  ;;  %v242_v51 = vrot.slane %v2965_v48, 1  ;;  %v2980_v57 = vmax.f32 %v31_v54, 0.0  ;;  %v72_v58 = vmax.f32 %v32_v55, 0.0  ;;  %v44_v54 = vld [vmem:[%s4272_s0 + $0xb8] sm:$0x3] }
   0xe   :  { %v243_v52 = vrot.slane %v70_v49, 1  ;;  %v2347_v62 = vpack.i.bf16 %v2958_v43, %v2955_v42  ;;  %v291_v63 = vrot.slane %v2965_v48, 2  ;;  %v292_v0 = vrot.slane %v70_v49, 2 }
   0xf   :  { %2323 = vrot.lane.b32.xlu1 %v2322_v31, %s2863_s15  ;;  %v245_v60 = vrot.slane %v2980_v57, 1  ;;  %v246_v61 = vrot.slane %v72_v58, 1  ;;  %v2352_v1 = vpack.i.bf16 %v2965_v48, %v2938_v24  ;;  %v3003_v9 = vmax.f32 %v33_v7, 0.0 }
  0x10   :  { %v244_v56 = vsel %vm133_vm0, %v242_v51, %v243_v52  ;;  %v2994_v5 = vsel %vm278_vm1, %v291_v63, %v292_v0  ;;  %v2367_v10 = vpack.i.bf16 %v2980_v57, %v2965_v48  ;;  %v294_v11 = vrot.slane %v2980_v57, 2  ;;  %v42_v52 = vld [vmem:[%s4272_s0 + $0xa8] sm:$0x3] }
  0x11   :  { %v2357_v59 = vpack.i.bf16 %v244_v56, %v241_v47  ;;  %v247_v2 = vsel %vm133_vm0, %v245_v60, %v246_v61  ;;  %v2362_v8 = vpack.i.bf16 %v2994_v5, %v2958_v43  ;;  %v295_v12 = vrot.slane %v72_v58, 2  ;;  %v39_v60 = vld [vmem:[%s4272_s0 + $0x90] sm:$0xff]  ;;  %v3082_v61 = vld [vmem:[%s4272_s0 + $0x98] sm:$0x3] }
  0x12   :  { %v2372_v3 = vpack.i.bf16 %v247_v2, %v244_v56  ;;  %v2387_v15 = vpack.i.bf16 %v3003_v9, %v2980_v57  ;;  %v74_v18 = vmax.f32 %v34_v14, 0.0  ;;  %v3025_v20 = vmax.f32 %v35_v16, 0.0  ;;  %v46_v16 = vld [vmem:[%s4272_s0 + $0xc8] sm:$0x3] }
  0x13   :  { %2313 = vrot.lane.b32.xlu0 %v2312_v46, %s2865_s17  ;;  %v3019_v17 = vsel %vm278_vm1, %v294_v11, %v295_v12  ;;  %v248_v21 = vrot.slane %v3003_v9, 1  ;;  %v76_v25 = vmax.f32 %v36_v19, 0.0  ;;  %v297_v26 = vrot.slane %v3003_v9, 2 }
  0x14   :  { %v249_v22 = vrot.slane %v74_v18, 1  ;;  %v2382_v23 = vpack.i.bf16 %v3019_v17, %v2994_v5  ;;  %v298_v27 = vrot.slane %v74_v18, 2  ;;  %v2402_v28 = vpack.i.bf16 %v3025_v20, %v3003_v9 }
  0x15   :  { %2333 = vrot.lane.b32.xlu2 %v2332_v53, %s2866_s22  ;;  %v300_v30 = vrot.slane %v3025_v20, 2  ;;  %v301_v31 = vrot.slane %v76_v25, 2  ;;  %v251_v36 = vrot.slane %v3025_v20, 1  ;;  %v252_v37 = vrot.slane %v76_v25, 1  ;;  %v43_v53 = vld [vmem:[%s4272_s0 + $0xb0] sm:$0xff] }
  0x16   :  { %v250_v29 = vsel %vm133_vm0, %v248_v21, %v249_v22  ;;  %v3038_v33 = vsel %vm278_vm1, %v297_v26, %v298_v27  ;;  %v77_v40 = vmax.f32 %v37_v34, 0.0  ;;  %v78_v41 = vmax.f32 %v38_v35, 0.0  ;;  %v48_v34 = vld [vmem:[%s4272_s0 + $0xd8] sm:$0x3] }
  0x17   :  { %2343 = vrot.lane.b32.xlu1 %v2342_v50, %s2862_s10  ;;  %v2392_v32 = vpack.i.bf16 %v250_v29, %v247_v2  ;;  %v2397_v38 = vpack.i.bf16 %v3038_v33, %v3019_v17  ;;  %v3051_v39 = vsel %vm278_vm1, %v300_v30, %v301_v31  ;;  %v253_v44 = vsel %vm133_vm0, %v251_v36, %v252_v37  ;;  %v47_v31 = vld [vmem:[%s4272_s0 + $0xd0] sm:$0xff] }
  0x18   :  { %v2417_v46 = vpack.i.bf16 %v3051_v39, %v3038_v33  ;;  %v337_v47 = vrot.slane %v77_v40, 2  ;;  %v338_v49 = vrot.slane %v78_v41, 2  ;;  %v2407_v51 = vpack.i.bf16 %v253_v44, %v250_v29 }
  0x19   :  { %v331_v55 = vrot.slane %v77_v40, 1  ;;  %v332_v56 = vrot.slane %v78_v41, 1  ;;  %v3084_v63 = vmax.f32 %v43_v53, 0.0  ;;  %v84_v0 = vmax.f32 %v44_v54, 0.0 }
  0x1a   :  { %v80_v7 = vmax.f32 %v3082_v61, 0.0  ;;  %v2422_v14 = vpack.i.bf16 %v77_v40, %v3025_v20  ;;  %v86_v26 = vmax.f32 %v46_v16, 0.0  ;;  %vm745_vm4 = vcmask 392192  }
  0x1b   :  { %2338 = vrot.lane.b32.xlu0 %v2342_v50, %s2867_s23  ;;  %v41_v50 = vld [vmem:[%s4272_s0 + $0xa0] sm:$0xff]  ;;  %v257_v11 = vrot.slane %v3084_v63, 1  ;;  %v258_v12 = vrot.slane %v84_v0, 1  ;;  %v306_v37 = vrot.slane %v3084_v63, 2  ;;  %vm762_vm5 = vcmask 523264  }
  0x1c   :  { %v3071_v58 = vmax.f32 %v41_v50, 0.0  ;;  %v348_v21 = vrot.slane %v80_v7, 1  ;;  %v261_v30 = vrot.slane %v86_v26, 1  ;;  %vm779_vm6 = vcmask 654336  }
  0x1d   :  { %2348 = vrot.lane.b32.xlu2 %v2347_v62, %s2865_s17  ;;  %v82_v62 = vmax.f32 %v42_v52, 0.0  ;;  %vm796_vm7 = vcmask 785408   ;;  %vm813_vm8 = vcmask 916480   ;;  %vm1061_vm9 = vcmask 254976  }
  0x1e   :  { %v303_v35 = vrot.slane %v3071_v58, 2 }
  0x1f   :  { %2358 = vrot.lane.b32.xlu1 %v2357_v59, %s2863_s15  ;;  %v3074_v59 = vsel %vm278_vm1, %v337_v47, %v338_v49  ;;  %v304_v36 = vrot.slane %v82_v62, 2  ;;  %v88_v47 = vmax.f32 %v48_v34, 0.0 }
  0x20   :  { %v2432_v2 = vpack.i.bf16 %v3074_v59, %v3051_v39 }
  0x21   :  { %v264_v53 = vrot.slane %v88_v47, 1 }
  0x23   :  { %2353 = vrot.lane.b32.xlu0 %v2352_v1, %s2861_s9  ;;  %v333_v1 = vsel %vm133_vm0, %v331_v55, %v332_v56  ;;  %v2275_v55 = vld [vmem:[%s4273_s1 + $0x30] sm:$0xff] }
  0x24   :  { %v2427_v18 = vpack.i.bf16 %v333_v1, %v253_v44 }
  0x25   :  { %2363 = vrot.lane.b32.xlu2 %v2362_v8, %s2864_s16  ;;  %v254_v8 = vrot.slane %v3071_v58, 1 }
  0x27   :  { %2373 = vrot.lane.b32.xlu1 %v2372_v3, %s2867_s23 }
  0x2b   :  { %2368 = vrot.lane.b32.xlu0 %v2367_v10, %s2866_s22  ;;  %v255_v10 = vrot.slane %v82_v62, 1 }
  0x2d   :  { %2378 = vrot.lane.b32.xlu2 %v2372_v3, %s2862_s10  ;;  %v3090_v3 = vmax.f32 %v39_v60, 0.0  ;;  %v256_v22 = vsel %vm133_vm0, %v254_v8, %v255_v10  ;;  %v310_v60 = vrot.slane %v86_v26, 2  ;;  %v2274_v8 = vld [vmem:[%s4273_s1 + $0x28] sm:$0xff]  ;;  %v49_v10 = vld [vmem:[%s4272_s0 + $0xe0] sm:$0xff] }
  0x2f   :  { %2388 = vrot.lane.b32.xlu1 %v2387_v15, %s2861_s9  ;;  %v45_v15 = vld [vmem:[%s4272_s0 + $0xc0] sm:$0xff]  ;;  %v347_v19 = vrot.slane %v3090_v3, 1 }
  0x30   :  { %v3109_v25 = vmax.f32 %v45_v15, 0.0 }
  0x32   :  { %v260_v29 = vrot.slane %v3109_v25, 1  ;;  %v309_v56 = vrot.slane %v3109_v25, 2  ;;  %v2457_v62 = vpack.i.bf16 %v3109_v25, %v3084_v63 }
  0x33   :  { %2383 = vrot.lane.b32.xlu0 %v2382_v23, %s2865_s17  ;;  %v259_v23 = vsel %vm133_vm0, %v257_v11, %v258_v12  ;;  %v3157_v12 = vmax.f32 %v49_v10, 0.0 }
  0x34   :  { %v2447_v27 = vpack.i.bf16 %v259_v23, %v256_v22  ;;  %v262_v44 = vsel %vm133_vm0, %v260_v29, %v261_v30  ;;  %v2272_v22 = vld [vmem:[%s4273_s1 + $0x18] sm:$0xff] }
  0x35   :  { %2393 = vrot.lane.b32.xlu2 %v2392_v32, %s2863_s15  ;;  %v2437_v32 = vpack.i.bf16 %v3090_v3, %v77_v40  ;;  %v305_v40 = vsel %vm278_vm1, %v303_v35, %v304_v36  ;;  %v2462_v50 = vpack.i.bf16 %v262_v44, %v259_v23  ;;  %v51_v23 = vld [vmem:[%s4272_s0 + $0xf0] sm:$0xff]  ;;  %v266_v30 = vrot.slane %v3157_v12, 1 }
  0x36   :  { %v3185_v29 = vmax.f32 %v51_v23, 0.0  ;;  %v315_v36 = vrot.slane %v3157_v12, 2 }
  0x37   :  { %2403 = vrot.lane.b32.xlu1 %v2402_v28, %s2866_s22  ;;  %v349_v28 = vsel %vm133_vm0, %v347_v19, %v348_v21  ;;  %v50_v19 = vld [vmem:[%s4272_s0 + $0xe8] sm:$0x3] }
  0x38   :  { %v2442_v41 = vpack.i.bf16 %v349_v28, %v333_v1  ;;  %v52_v28 = vld [vmem:[%s4272_s0 + $0xf8] sm:$0x3] }
  0x39   :  { %v92_v35 = vmax.f32 %v52_v28, 0.0 }
  0x3b   :  { %2398 = vrot.lane.b32.xlu0 %v2397_v38, %s2864_s16  ;;  %v307_v38 = vrot.slane %v84_v0, 2 }
  0x3d   :  { %2408 = vrot.lane.b32.xlu2 %v2407_v51, %s2867_s23  ;;  %v308_v49 = vsel %vm278_vm1, %v306_v37, %v307_v38 }
  0x3e   :  { %v2452_v54 = vpack.i.bf16 %v308_v49, %v305_v40  ;;  %v318_v40 = vrot.slane %v3185_v29, 2 }
  0x3f   :  { %2418 = vrot.lane.b32.xlu1 %v2417_v46, %s2865_s17  ;;  %v3126_v46 = vmax.f32 %v47_v31, 0.0 }
  0x41   :  { %v263_v52 = vrot.slane %v3126_v46, 1  ;;  %v2472_v15 = vpack.i.bf16 %v3126_v46, %v3109_v25  ;;  %v312_v16 = vrot.slane %v3126_v46, 2  ;;  %v2492_v21 = vpack.i.bf16 %v3157_v12, %v3126_v46 }
  0x43   :  { %2413 = vrot.lane.b32.xlu0 %v2407_v51, %s2862_s10  ;;  %v2276_v51 = vld [vmem:[%s4273_s1 + $0x38] sm:$0xff]  ;;  %v265_v0 = vsel %vm133_vm0, %v263_v52, %v264_v53  ;;  %v53_v52 = vld [vmem:[%s4272_s0 + $0x100] sm:$0xff]  ;;  %v54_v53 = vld [vmem:[%s4272_s0 + $0x108] sm:$0x3] }
  0x44   :  { %946 = vmatpush.bf16.msra.mxu0 %v2276_v51  ;;  %v2477_v1 = vpack.i.bf16 %v265_v0, %v262_v44 }
  0x45   :  { %2423 = vrot.lane.b32.xlu2 %v2422_v14, %s2861_s9  ;;  %v2273_v14 = vld [vmem:[%s4273_s1 + $0x20] sm:$0xff] }
  0x47   :  { %2433 = vrot.lane.b32.xlu1 %v2432_v2, %s2864_s16  ;;  %v3146_v2 = vsel %vm278_vm1, %v309_v56, %v310_v60  ;;  %v2269_v56 = vld [vmem:[%s4273_s1] sm:$0xff] }
  0x48   :  { %947 = vmatpush.bf16.msra.mxu0 %v2275_v55  ;;  %v2467_v11 = vpack.i.bf16 %v3146_v2, %v308_v49  ;;  %v319_v49 = vrot.slane %v92_v35, 2  ;;  %v270_v55 = vrot.slane %v92_v35, 1  ;;  %v3260_v35 = vld [vmem:[%s4272_s0 + $0x128] sm:$0x3] }
  0x4b   :  { %2428 = vrot.lane.b32.xlu0 %v2427_v18, %s2863_s15  ;;  %v313_v18 = vrot.slane %v88_v47, 2  ;;  %v2270_v47 = vld [vmem:[%s4273_s1 + $0x8] sm:$0xff] }
  0x4c   :  { %948 = vmatpush.bf16.msra.mxu0 %v2274_v8 }
  0x4d   :  { %2438 = vrot.lane.b32.xlu2 %v2437_v32, %s2866_s22  ;;  %v3179_v26 = vsel %vm278_vm1, %v312_v16, %v313_v18  ;;  %v2271_v32 = vld [vmem:[%s4273_s1 + $0x10] sm:$0xff] }
  0x4e   :  { %v2487_v34 = vpack.i.bf16 %v3179_v26, %v3146_v2  ;;  %v55_v18 = vld [vmem:[%s4272_s0 + $0x110] sm:$0xff] }
  0x4f   :  { %2448 = vrot.lane.b32.xlu1 %v2447_v27, %s2862_s10  ;;  %v90_v27 = vmax.f32 %v50_v19, 0.0  ;;  %v56_v19 = vld [vmem:[%s4272_s0 + $0x118] sm:$0x3] }
  0x50   :  { %949 = vmatpush.bf16.msra.mxu0 %v2273_v14  ;;  %v96_v23 = vmax.f32 %v56_v19, 0.0 }
  0x51   :  { %v267_v31 = vrot.slane %v90_v27, 1  ;;  %v316_v37 = vrot.slane %v90_v27, 2 }
  0x52   :  { %v325_v19 = vrot.slane %v96_v23, 2 }
  0x53   :  { %2443 = vrot.lane.b32.xlu0 %v2442_v41, %s2867_s23  ;;  %v2507_v41 = vpack.i.bf16 %v3185_v29, %v3157_v12  ;;  %v268_v44 = vsel %vm133_vm0, %v266_v30, %v267_v31  ;;  %v3206_v51 = vsel %vm278_vm1, %v315_v36, %v316_v37  ;;  %v276_v37 = vrot.slane %v96_v23, 1 }
  0x54   :  { %950 = vmatpush.bf16.msra.mxu0 %v2272_v22  ;;  %v2502_v60 = vpack.i.bf16 %v3206_v51, %v3179_v26  ;;  %v3244_v22 = vmax.f32 %v55_v18, 0.0 }
  0x55   :  { %2453 = vrot.lane.b32.xlu2 %v2452_v54, %s2865_s17  ;;  %v269_v54 = vrot.slane %v3185_v29, 1 }
  0x56   :  { %v275_v36 = vrot.slane %v3244_v22, 1  ;;  %v324_v18 = vrot.slane %v3244_v22, 2 }
  0x57   :  { %2463 = vrot.lane.b32.xlu1 %v2462_v50, %s2863_s15  ;;  %v2497_v50 = vpack.i.bf16 %v268_v44, %v265_v0  ;;  %v3224_v0 = vmax.f32 %v53_v52, 0.0  ;;  %v271_v10 = vsel %vm133_vm0, %v269_v54, %v270_v55 }
  0x58   :  { %951 = vmatpush.bf16.msra.mxu0 %v2271_v32  ;;  %v2512_v16 = vpack.i.bf16 %v271_v10, %v268_v44 }
  0x59   :  { %v321_v14 = vrot.slane %v3224_v0, 2  ;;  %v272_v28 = vrot.slane %v3224_v0, 1 }
  0x5b   :  { %2458 = vrot.lane.b32.xlu0 %v2457_v62, %s2861_s9  ;;  %v3222_v62 = vsel %vm278_vm1, %v318_v40, %v319_v49  ;;  %v98_v49 = vmax.f32 %v3260_v35, 0.0 }
  0x5c   :  { %952 = vmatpush.bf16.msra.mxu0 %v2270_v47 }
  0x5d   :  { %2468 = vrot.lane.b32.xlu2 %v2467_v11, %s2864_s16  ;;  %v2522_v11 = vpack.i.bf16 %v3222_v62, %v3206_v51 }
  0x5f   :  { %2478 = vrot.lane.b32.xlu1 %v2477_v1, %s2867_s23 }
  0x60   :  { %953 = vmatpush.bf16.msra.mxu0 %v2269_v56  ;;  %v335_v56 = vrot.slane %v98_v49, 1 }
  0x63   :  { %2473 = vrot.lane.b32.xlu0 %v2472_v15, %s2866_s22 }
  0x65   :  { %2483 = vrot.lane.b32.xlu2 %v2477_v1, %s2862_s10  ;;  %v94_v1 = vmax.f32 %v54_v53, 0.0  ;;  %v3275_v53 = vsel %vm133_vm0, %v275_v36, %v276_v37 }
  0x67   :  { %2493 = vrot.lane.b32.xlu1 %v2492_v21, %s2861_s9  ;;  %v3195_v38 = vpop.permute.xlu2 %2328  ;;  %v322_v15 = vrot.slane %v94_v1, 2  ;;  %v273_v30 = vrot.slane %v94_v1, 1 }
  0x69   :  { %v3242_v21 = vsel %vm278_vm1, %v321_v14, %v322_v15  ;;  %v274_v44 = vsel %vm133_vm0, %v272_v28, %v273_v30  ;;  %v833_v28 = vpack.c.bf16 %v3019_v17, %v2994_v5  ;;  %v2331_v30 = vunpack.i.h.bf16 %v3195_v38 }
  0x6a   :  { %v2537_v32 = vpack.i.bf16 %v3242_v21, %v3222_v62  ;;  %v2532_v52 = vpack.i.bf16 %v274_v44, %v271_v10  ;;  %v2552_v1 = vpack.i.bf16 %v3275_v53, %v274_v44  ;;  %v59_v10 = vld [vmem:[%s4272_s0 + $0x130] sm:$0xff] }
  0x6b   :  { %2488 = vrot.lane.b32.xlu0 %v2487_v34, %s2865_s17  ;;  %v57_v34 = vld [vmem:[%s4272_s0 + $0x120] sm:$0xff]  ;;  %v3302_v36 = vmax.f32 %v59_v10, 0.0 }
  0x6c   :  { %v3267_v40 = vmax.f32 %v57_v34, 0.0 }
  0x6d   :  { %2498 = vrot.lane.b32.xlu2 %v2497_v50, %s2863_s15  ;;  %v2277_v50 = vld [vmem:[%s4273_s1 + $0x40] sm:$0xff] }
  0x6e   :  { %2296 = vmatpush.bf16.msra.mxu1 %v2277_v50  ;;  %1002 = vmatpush.bf16.msrb.mxu0 %v2277_v50  ;;  %v334_v55 = vrot.slane %v3267_v40, 1 }
  0x6f   :  { %2508 = vrot.lane.b32.xlu1 %v2507_v41, %s2866_s22  ;;  %v3227_v8 = vpop.permute.xlu2 %2333  ;;  %v2527_v41 = vpack.i.bf16 %v3224_v0, %v3185_v29  ;;  %2297 = vmatpush.bf16.msra.mxu2 %v2277_v50 }
  0x70   :  { %2298 = vmatpush.bf16.msra.mxu3 %v2277_v50  ;;  %v3300_v34 = vsel %vm133_vm0, %v334_v55, %v335_v56  ;;  %v2330_v55 = vunpack.i.l.bf16 %v3195_v38 }
  0x71   :  { %2182 = vmatmul.msk.bf16.vlgmr.msra.gmra.mxu1 %vm711_vm2, %v833_v28  ;;  %v3318_v28 = vsel %vm278_vm1, %v324_v18, %v325_v19  ;;  %v2335_v18 = vunpack.i.l.bf16 %v3227_v8  ;;  %v350_v19 = vrot.slane %v3302_v36, 1 }
  0x73   :  { %2503 = vrot.lane.b32.xlu0 %v2502_v60, %s2864_s16 }
  0x75   :  { %2513 = vrot.lane.b32.xlu2 %v2512_v16, %s2867_s23 }
  0x77   :  { %2523 = vrot.lane.b32.xlu1 %v2522_v11, %s2865_s17  ;;  %v3250_v31 = vpop.permute.xlu2 %2348  ;;  %v3290_v11 = vld [vmem:[%s4272_s0 + $0x138] sm:$0x3] }
  0x78   :  { %v100_v37 = vmax.f32 %v3290_v11, 0.0 }
  0x79   :  { %v3247_v27 = vpop.permute.xlu1 %2318 }
  0x7a   :  { %v2321_v23 = vunpack.i.h.bf16 %v3247_v27 }
  0x7b   :  { %2518 = vrot.lane.b32.xlu0 %v2512_v16, %s2862_s10  ;;  %v2542_v16 = vpack.i.bf16 %v3244_v22, %v3224_v0 }
  0x7d   :  { %v2309_v47 = vpop.permute.xlu0 %2308  ;;  %2528 = vrot.lane.b32.xlu2 %v2527_v41, %s2861_s9 }
  0x7e   :  { %v2311_v14 = vunpack.i.h.bf16 %v2309_v47  ;;  %v2310_v15 = vunpack.i.l.bf16 %v2309_v47 }
  0x7f   :  { %2538 = vrot.lane.b32.xlu1 %v2537_v32, %s2864_s16  ;;  %v3281_v60 = vpop.permute.xlu2 %2363 }
  0x80   :  { %v713_v5 = vsel %vm711_vm2, %v2911_v4, %v2311_v14  ;;  %v712_v17 = vsel %vm711_vm2, %v2923_v13, %v2310_v15  ;;  %v2336_v15 = vunpack.i.h.bf16 %v3227_v8 }
  0x81   :  { %v2324_v54 = vpop.permute.xlu1 %2323 }
  0x82   :  { %v2326_v47 = vunpack.i.h.bf16 %v2324_v54  ;;  %v2325_v50 = vunpack.i.l.bf16 %v2324_v54 }
  0x83   :  { %2533 = vrot.lane.b32.xlu0 %v2532_v52, %s2863_s15  ;;  %v2320_v52 = vunpack.i.l.bf16 %v3247_v27 }
  0x85   :  { %v2314_v32 = vpop.permute.xlu0 %2313  ;;  %2543 = vrot.lane.b32.xlu2 %v2542_v16, %s2866_s22  ;;  %v2567_v16 = vpack.i.bf16 %v3300_v34, %v3275_v53  ;;  %v341_v53 = vrot.slane %v98_v49, 2 }
  0x86   :  { %v2316_v41 = vunpack.i.h.bf16 %v2314_v32  ;;  %v2315_v44 = vunpack.i.l.bf16 %v2314_v32  ;;  %v351_v32 = vrot.slane %v100_v37, 1 }
  0x87   :  { %2553 = vrot.lane.b32.xlu1 %v2552_v1, %s2862_s10  ;;  %v3322_v14 = vpop.permute.xlu2 %2378 }
  0x88   :  { %v729_v54 = vsel %vm728_vm3, %v712_v17, %v2315_v44  ;;  %v730_v56 = vsel %vm728_vm3, %v713_v5, %v2316_v41  ;;  %v2557_v41 = vpack.i.bf16 %v3318_v28, %v3242_v21  ;;  %v2562_v17 = vpack.i.bf16 %v3267_v40, %v3244_v22 }
  0x89   :  { %v2344_v10 = vpop.permute.xlu1 %2343  ;;  %v746_v4 = vsel %vm745_vm4, %v729_v54, %v2320_v52  ;;  %v747_v13 = vsel %vm745_vm4, %v730_v56, %v2321_v23 }
  0x8a   :  { %v763_v27 = vsel %vm762_vm5, %v746_v4, %v2325_v50  ;;  %v764_v38 = vsel %vm762_vm5, %v747_v13, %v2326_v47  ;;  %v340_v50 = vrot.slane %v3267_v40, 2  ;;  %v2346_v56 = vunpack.i.h.bf16 %v2344_v10 }
  0x8b   :  { %2548 = vrot.lane.b32.xlu0 %v2552_v1, %s2867_s23  ;;  %v780_v44 = vsel %vm779_vm6, %v763_v27, %v2330_v55  ;;  %v781_v47 = vsel %vm779_vm6, %v764_v38, %v2331_v30  ;;  %v352_v30 = vsel %vm133_vm0, %v350_v19, %v351_v32  ;;  %v2345_v4 = vunpack.i.l.bf16 %v2344_v10 }
  0x8c   :  { %v797_v23 = vsel %vm796_vm7, %v780_v44, %v2335_v18  ;;  %v798_v52 = vsel %vm796_vm7, %v781_v47, %v2336_v15  ;;  %v3351_v54 = vsel %vm278_vm1, %v340_v50, %v341_v53  ;;  %v2582_v38 = vpack.i.bf16 %v352_v30, %v3300_v34 }
  0x8d   :  { %v2339_v8 = vpop.permute.xlu0 %2338  ;;  %2558 = vrot.lane.b32.xlu2 %v2557_v41, %s2865_s17  ;;  %v2572_v15 = vpack.i.bf16 %v3351_v54, %v3318_v28  ;;  %v2350_v18 = vunpack.i.l.bf16 %v3250_v31  ;;  %v715_v19 = vsel %vm711_vm2, %v2938_v24, %v2346_v56  ;;  %v714_v10 = vsel %vm711_vm2, %v2913_v6, %v2345_v4 }
  0x8e   :  { %v2341_v1 = vunpack.i.h.bf16 %v2339_v8  ;;  %v2340_v5 = vunpack.i.l.bf16 %v2339_v8  ;;  %v835_v34 = vpack.c.bf16 %v3051_v39, %v3038_v33  ;;  %v2577_v47 = vpack.i.bf16 %v3302_v36, %v3267_v40 }
  0x8f   :  { %2568 = vrot.lane.b32.xlu1 %v2567_v16, %s2863_s15  ;;  %v3353_v27 = vpop.permute.xlu2 %2393  ;;  %v2351_v16 = vunpack.i.h.bf16 %v3250_v31  ;;  %v731_v24 = vsel %vm728_vm3, %v714_v10, %v2350_v18  ;;  %v2365_v40 = vunpack.i.l.bf16 %v3281_v60  ;;  %v2380_v18 = vunpack.i.l.bf16 %v3322_v14 }
  0x90   :  { %v814_v35 = vsel %vm813_vm8, %v797_v23, %v2340_v5  ;;  %v815_v49 = vsel %vm813_vm8, %v798_v52, %v2341_v1  ;;  %2183 = vmatmul.msk.bf16.gmra.mxu1 %vm711_vm2, %v835_v34  ;;  %v2366_v1 = vunpack.i.h.bf16 %v3281_v60  ;;  %v353_v10 = vrot.slane %v3090_v3, 2 }
  0x91   :  { %v2359_v55 = vpop.permute.xlu1 %2358  ;;  %v830_v13 = vpack.c.bf16 %v815_v49, %v814_v35  ;;  %v732_v31 = vsel %vm728_vm3, %v715_v19, %v2351_v16 }
  0x92   :  { %v2361_v6 = vunpack.i.h.bf16 %v2359_v55  ;;  %v2360_v50 = vunpack.i.l.bf16 %v2359_v55 }
  0x93   :  { %2563 = vrot.lane.b32.xlu0 %v2562_v17, %s2861_s9  ;;  %954 = vmatmul.bf16.vlgmr.msra.gmra.mxu0 %v830_v13 }
  0x95   :  { %v2354_v32 = vpop.permute.xlu0 %2353  ;;  %2573 = vrot.lane.b32.xlu2 %v2572_v15, %s2864_s16 }
  0x96   :  { %v2356_v41 = vunpack.i.h.bf16 %v2354_v32  ;;  %v2355_v44 = vunpack.i.l.bf16 %v2354_v32  ;;  %v354_v32 = vrot.slane %v80_v7, 2 }
  0x97   :  { %2583 = vrot.lane.b32.xlu1 %v2582_v38, %s2867_s23  ;;  %v2409_v8 = vpop.permute.xlu2 %2408  ;;  %v2381_v38 = vunpack.i.h.bf16 %v3322_v14 }
  0x98   :  { %v749_v33 = vsel %vm745_vm4, %v732_v31, %v2356_v41  ;;  %v748_v39 = vsel %vm745_vm4, %v731_v24, %v2355_v44  ;;  %v716_v24 = vsel %vm711_vm2, %v2965_v48, %v2380_v18 }
  0x99   :  { %v2374_v53 = vpop.permute.xlu1 %2373  ;;  %v765_v5 = vsel %vm762_vm5, %v748_v39, %v2360_v50  ;;  %v766_v17 = vsel %vm762_vm5, %v749_v33, %v2361_v6  ;;  %v717_v41 = vsel %vm711_vm2, %v2980_v57, %v2381_v38  ;;  %v2396_v57 = vunpack.i.h.bf16 %v3353_v27 }
  0x9a   :  { %v2376_v52 = vunpack.i.h.bf16 %v2374_v53  ;;  %v2375_v30 = vunpack.i.l.bf16 %v2374_v53  ;;  %v782_v55 = vsel %vm779_vm6, %v765_v5, %v2365_v40  ;;  %v783_v56 = vsel %vm779_vm6, %v766_v17, %v2366_v1 }
  0x9b   :  { %2578 = vrot.lane.b32.xlu0 %v2577_v47, %s2866_s22  ;;  %v355_v47 = vsel %vm278_vm1, %v353_v10, %v354_v32  ;;  %v2395_v33 = vunpack.i.l.bf16 %v3353_v27 }
  0x9c   :  { %v837_v14 = vpack.c.bf16 %v355_v47, %v3074_v59 }
  0x9d   :  { %v2369_v23 = vpop.permute.xlu0 %2368 }
  0x9e   :  { %v2371_v35 = vunpack.i.h.bf16 %v2369_v23  ;;  %v2370_v49 = vunpack.i.l.bf16 %v2369_v23  ;;  %2184 = vmatmul.msk.bf16.vlgmr.msra.gmra.mxu2 %vm711_vm2, %v837_v14  ;;  %v2411_v23 = vunpack.i.h.bf16 %v2409_v8 }
  0x9f   :  { %v2424_v34 = vpop.permute.xlu2 %2423 }
  0xa0   :  { %v799_v4 = vsel %vm796_vm7, %v782_v55, %v2370_v49  ;;  %v800_v13 = vsel %vm796_vm7, %v783_v56, %v2371_v35 }
  0xa1   :  { %v2389_v60 = vpop.permute.xlu1 %2388  ;;  %v816_v15 = vsel %vm813_vm8, %v799_v4, %v2375_v30  ;;  %v817_v16 = vsel %vm813_vm8, %v800_v13, %v2376_v52  ;;  %v2410_v52 = vunpack.i.l.bf16 %v2409_v8 }
  0xa2   :  { %v832_v19 = vpack.c.bf16 %v817_v16, %v816_v15  ;;  %v2391_v50 = vunpack.i.h.bf16 %v2389_v60  ;;  %v2390_v3 = vunpack.i.l.bf16 %v2389_v60 }
  0xa4   :  { %959 = vmatmul.bf16.gmra.mxu0 %v832_v19  ;;  %v839_v19 = vpack.c.bf16 %v3179_v26, %v3146_v2 }
  0xa5   :  { %v2384_v44 = vpop.permute.xlu0 %2383 }
  0xa6   :  { %v2386_v31 = vunpack.i.h.bf16 %v2384_v44  ;;  %v2385_v6 = vunpack.i.l.bf16 %v2384_v44 }
  0xa7   :  { %v2439_v30 = vpop.permute.xlu2 %2438 }
  0xa8   :  { %v734_v61 = vsel %vm728_vm3, %v717_v41, %v2386_v31  ;;  %v733_v7 = vsel %vm728_vm3, %v716_v24, %v2385_v6  ;;  %v2426_v31 = vunpack.i.h.bf16 %v2424_v34  ;;  %v2425_v6 = vunpack.i.l.bf16 %v2424_v34 }
  0xa9   :  { %v2404_v53 = vpop.permute.xlu1 %2403  ;;  %v750_v39 = vsel %vm745_vm4, %v733_v7, %v2390_v3  ;;  %v751_v48 = vsel %vm745_vm4, %v734_v61, %v2391_v50  ;;  %v2441_v34 = vunpack.i.h.bf16 %v2439_v30 }
  0xaa   :  { %v2406_v40 = vunpack.i.h.bf16 %v2404_v53  ;;  %v2405_v59 = vunpack.i.l.bf16 %v2404_v53  ;;  %v767_v35 = vsel %vm762_vm5, %v750_v39, %v2395_v33  ;;  %v768_v49 = vsel %vm762_vm5, %v751_v48, %v2396_v57 }
  0xab   :  { %v2440_v48 = vunpack.i.l.bf16 %v2439_v30 }
  0xad   :  { %v2399_v1 = vpop.permute.xlu0 %2398 }
  0xae   :  { %v2401_v5 = vunpack.i.h.bf16 %v2399_v1  ;;  %v2400_v17 = vunpack.i.l.bf16 %v2399_v1  ;;  %2185 = vmatmul.msk.bf16.gmra.mxu2 %vm711_vm2, %v839_v19 }
  0xaf   :  { %v2454_v32 = vpop.permute.xlu2 %2453 }
  0xb0   :  { %v784_v55 = vsel %vm779_vm6, %v767_v35, %v2400_v17  ;;  %v785_v27 = vsel %vm779_vm6, %v768_v49, %v2401_v5  ;;  %v841_v35 = vpack.c.bf16 %v3222_v62, %v3206_v51 }
  0xb1   :  { %v2419_v56 = vpop.permute.xlu1 %2418  ;;  %v801_v4 = vsel %vm796_vm7, %v784_v55, %v2405_v59  ;;  %v802_v13 = vsel %vm796_vm7, %v785_v27, %v2406_v40 }
  0xb2   :  { %v818_v60 = vsel %vm813_vm8, %v801_v4, %v2410_v52  ;;  %v819_v38 = vsel %vm813_vm8, %v802_v13, %v2411_v23  ;;  %v2421_v41 = vunpack.i.h.bf16 %v2419_v56  ;;  %v2420_v44 = vunpack.i.l.bf16 %v2419_v56  ;;  %2186 = vmatmul.msk.bf16.vlgmr.msra.gmra.mxu3 %vm711_vm2, %v841_v35 }
  0xb3   :  { %v834_v15 = vpack.c.bf16 %v819_v38, %v818_v60  ;;  %v2456_v13 = vunpack.i.h.bf16 %v2454_v32  ;;  %v2455_v60 = vunpack.i.l.bf16 %v2454_v32 }
  0xb5   :  { %v2414_v8 = vpop.permute.xlu0 %2413  ;;  %964 = vmatmul.bf16.gmra.mxu0 %v834_v15 }
  0xb6   :  { %v2416_v16 = vunpack.i.h.bf16 %v2414_v8  ;;  %v2415_v18 = vunpack.i.l.bf16 %v2414_v8 }
  0xb7   :  { %v2469_v39 = vpop.permute.xlu2 %2468 }
  0xb8   :  { %v719_v47 = vsel %vm711_vm2, %v3025_v20, %v2416_v16  ;;  %v718_v24 = vsel %vm711_vm2, %v3003_v9, %v2415_v18 }
  0xb9   :  { %v2434_v10 = vpop.permute.xlu1 %2433  ;;  %v735_v14 = vsel %vm728_vm3, %v718_v24, %v2420_v44  ;;  %v736_v50 = vsel %vm728_vm3, %v719_v47, %v2421_v41  ;;  %v2471_v24 = vunpack.i.h.bf16 %v2469_v39 }
  0xba   :  { %v752_v53 = vsel %vm745_vm4, %v735_v14, %v2425_v6  ;;  %v753_v61 = vsel %vm745_vm4, %v736_v50, %v2426_v31  ;;  %v2436_v7 = vunpack.i.h.bf16 %v2434_v10  ;;  %v2435_v57 = vunpack.i.l.bf16 %v2434_v10 }
  0xbb   :  { %v2470_v31 = vunpack.i.l.bf16 %v2469_v39 }
  0xbd   :  { %v2429_v3 = vpop.permute.xlu0 %2428 }
  0xbe   :  { %v2431_v2 = vunpack.i.h.bf16 %v2429_v3  ;;  %v2430_v26 = vunpack.i.l.bf16 %v2429_v3 }
  0xbf   :  { %v2484_v38 = vpop.permute.xlu2 %2483 }
  0xc0   :  { %v769_v20 = vsel %vm762_vm5, %v752_v53, %v2430_v26  ;;  %v770_v9 = vsel %vm762_vm5, %v753_v61, %v2431_v2  ;;  %v2486_v39 = vunpack.i.h.bf16 %v2484_v38 }
  0xc1   :  { %v2449_v33 = vpop.permute.xlu1 %2448  ;;  %v786_v1 = vsel %vm779_vm6, %v769_v20, %v2435_v57  ;;  %v787_v40 = vsel %vm779_vm6, %v770_v9, %v2436_v7 }
  0xc2   :  { %v803_v23 = vsel %vm796_vm7, %v786_v1, %v2440_v48  ;;  %v804_v52 = vsel %vm796_vm7, %v787_v40, %v2441_v34  ;;  %v2451_v30 = vunpack.i.h.bf16 %v2449_v33  ;;  %v2450_v56 = vunpack.i.l.bf16 %v2449_v33 }
  0xc3   :  { %v2485_v34 = vunpack.i.l.bf16 %v2484_v38  ;;  %v843_v40 = vpack.c.bf16 %v3318_v28, %v3242_v21 }
  0xc4   :  { %v721_v15 = vsel %vm711_vm2, %v3084_v63, %v2451_v30  ;;  %v720_v51 = vsel %vm711_vm2, %v3071_v58, %v2450_v56 }
  0xc5   :  { %v2444_v59 = vpop.permute.xlu0 %2443  ;;  %v737_v18 = vsel %vm728_vm3, %v720_v51, %v2455_v60  ;;  %v738_v19 = vsel %vm728_vm3, %v721_v15, %v2456_v13  ;;  %2187 = vmatmul.msk.bf16.gmra.mxu3 %vm711_vm2, %v843_v40 }
  0xc6   :  { %v2446_v5 = vunpack.i.h.bf16 %v2444_v59  ;;  %v2445_v17 = vunpack.i.l.bf16 %v2444_v59  ;;  %v723_v59 = vsel %vm711_vm2, %v3126_v46, %v2486_v39 }
  0xc7   :  { %v2499_v26 = vpop.permute.xlu2 %2498 }
  0xc8   :  { %v820_v49 = vsel %vm813_vm8, %v803_v23, %v2445_v17  ;;  %v821_v55 = vsel %vm813_vm8, %v804_v52, %v2446_v5  ;;  %v722_v5 = vsel %vm711_vm2, %v3109_v25, %v2485_v34  ;;  %v2501_v56 = vunpack.i.h.bf16 %v2499_v26 }
  0xc9   :  { %v2464_v27 = vpop.permute.xlu1 %2463  ;;  %v836_v4 = vpack.c.bf16 %v821_v55, %v820_v49  ;;  %v2500_v21 = vunpack.i.l.bf16 %v2499_v26 }
  0xca   :  { %v2466_v10 = vunpack.i.h.bf16 %v2464_v27  ;;  %v2465_v41 = vunpack.i.l.bf16 %v2464_v27 }
  0xcb   :  { %969 = vmatmul.bf16.gmra.mxu0 %v836_v4 }
  0xcd   :  { %v2459_v62 = vpop.permute.xlu0 %2458 }
  0xce   :  { %v2461_v8 = vunpack.i.h.bf16 %v2459_v62  ;;  %v2460_v16 = vunpack.i.l.bf16 %v2459_v62 }
  0xcf   :  { %v2514_v55 = vpop.permute.xlu2 %2513 }
  0xd0   :  { %v755_v47 = vsel %vm745_vm4, %v738_v19, %v2461_v8  ;;  %v754_v32 = vsel %vm745_vm4, %v737_v18, %v2460_v16  ;;  %v2516_v15 = vunpack.i.h.bf16 %v2514_v55  ;;  %v2515_v51 = vunpack.i.l.bf16 %v2514_v55 }
  0xd1   :  { %v2479_v44 = vpop.permute.xlu1 %2478  ;;  %v771_v63 = vsel %vm762_vm5, %v754_v32, %v2465_v41  ;;  %v772_v58 = vsel %vm762_vm5, %v755_v47, %v2466_v10 }
  0xd2   :  { %v2481_v14 = vunpack.i.h.bf16 %v2479_v44  ;;  %v2480_v50 = vunpack.i.l.bf16 %v2479_v44  ;;  %v788_v53 = vsel %vm779_vm6, %v771_v63, %v2470_v31  ;;  %v789_v61 = vsel %vm779_vm6, %v772_v58, %v2471_v24 }
  0xd3   :  { %v356_v31 = vrot.slane %v3302_v36, 2  ;;  %v357_v63 = vrot.slane %v100_v37, 2 }
  0xd5   :  { %v2474_v6 = vpop.permute.xlu0 %2473 }
  0xd6   :  { %v2476_v3 = vunpack.i.h.bf16 %v2474_v6  ;;  %v2475_v2 = vunpack.i.l.bf16 %v2474_v6  ;;  %v358_v6 = vsel %vm278_vm1, %v356_v31, %v357_v63 }
  0xd7   :  { %v2529_v32 = vpop.permute.xlu2 %2528 }
  0xd8   :  { %v805_v7 = vsel %vm796_vm7, %v788_v53, %v2475_v2  ;;  %v806_v57 = vsel %vm796_vm7, %v789_v61, %v2476_v3  ;;  %v845_v3 = vpack.c.bf16 %v358_v6, %v3351_v54  ;;  %v2531_v36 = vunpack.i.h.bf16 %v2529_v32 }
  0xd9   :  { %v2494_v33 = vpop.permute.xlu1 %2493  ;;  %v822_v20 = vsel %vm813_vm8, %v805_v7, %v2480_v50  ;;  %v823_v9 = vsel %vm813_vm8, %v806_v57, %v2481_v14  ;;  %v2530_v37 = vunpack.i.l.bf16 %v2529_v32 }
  0xda   :  { %v838_v48 = vpack.c.bf16 %v823_v9, %v822_v20  ;;  %v2496_v52 = vunpack.i.h.bf16 %v2494_v33  ;;  %v2495_v35 = vunpack.i.l.bf16 %v2494_v33  ;;  %2188 = vmatmul.msk.bf16.gmra.mxu3 %vm711_vm2, %v845_v3 }
  0xdc   :  { %974 = vmatmul.bf16.gmra.mxu0 %v838_v48 }
  0xdd   :  { %v2489_v1 = vpop.permute.xlu0 %2488 }
  0xde   :  { %v2491_v17 = vunpack.i.h.bf16 %v2489_v1  ;;  %v2490_v23 = vunpack.i.l.bf16 %v2489_v1 }
  0xdf   :  { %v2544_v7 = vpop.permute.xlu2 %2543 }
  0xe0   :  { %v740_v27 = vsel %vm728_vm3, %v723_v59, %v2491_v17  ;;  %v739_v30 = vsel %vm728_vm3, %v722_v5, %v2490_v23  ;;  %v2546_v59 = vunpack.i.h.bf16 %v2544_v7  ;;  %v2545_v5 = vunpack.i.l.bf16 %v2544_v7 }
  0xe1   :  { %v2509_v49 = vpop.permute.xlu1 %2508  ;;  %v756_v28 = vsel %vm745_vm4, %v739_v30, %v2495_v35  ;;  %v757_v46 = vsel %vm745_vm4, %v740_v27, %v2496_v52 }
  0xe2   :  { %v2511_v25 = vunpack.i.h.bf16 %v2509_v49  ;;  %v2510_v13 = vunpack.i.l.bf16 %v2509_v49  ;;  %v773_v62 = vsel %vm762_vm5, %v756_v28, %v2500_v21  ;;  %v774_v8 = vsel %vm762_vm5, %v757_v46, %v2501_v56 }
  0xe5   :  { %v2504_v4 = vpop.permute.xlu0 %2503 }
  0xe6   :  { %v2506_v60 = vunpack.i.h.bf16 %v2504_v4  ;;  %v2505_v38 = vunpack.i.l.bf16 %v2504_v4 }
  0xe7   :  { %v2559_v55 = vpop.permute.xlu2 %2558 }
  0xe8   :  { %v790_v16 = vsel %vm779_vm6, %v773_v62, %v2505_v38  ;;  %v791_v18 = vsel %vm779_vm6, %v774_v8, %v2506_v60  ;;  %v2560_v60 = vunpack.i.l.bf16 %v2559_v55 }
  0xe9   :  { %v2524_v19 = vpop.permute.xlu1 %2523  ;;  %v807_v10 = vsel %vm796_vm7, %v790_v16, %v2510_v13  ;;  %v808_v41 = vsel %vm796_vm7, %v791_v18, %v2511_v25  ;;  %v2561_v13 = vunpack.i.h.bf16 %v2559_v55  ;;  %v2868_v16 = vmov 0.0  }
  0xea   :  { %v824_v44 = vsel %vm813_vm8, %v807_v10, %v2515_v51  ;;  %v825_v47 = vsel %vm813_vm8, %v808_v41, %v2516_v15  ;;  %v2526_v26 = vunpack.i.h.bf16 %v2524_v19  ;;  %v2525_v53 = vunpack.i.l.bf16 %v2524_v19  ;;  %1067 = vst.msk [vmem:[#allocation2 + $0x30] sm:$0xff] %vm728_vm3, %v2868_v16 }
  0xeb   :  { %v840_v24 = vpack.c.bf16 %v825_v47, %v824_v44  ;;  %1068 = vst.msk [vmem:[#allocation2 + $0x38] sm:$0x3] %vm1061_vm9, %v2868_v16 }
  0xec   :  { %1060 = vst.msk [vmem:[#allocation2] sm:$0xff] %vm728_vm3, %v2868_v16 }
  0xed   :  { %v2519_v58 = vpop.permute.xlu0 %2518  ;;  %979 = vmatmul.bf16.gmra.mxu0 %v840_v24  ;;  %1062 = vst.msk [vmem:[#allocation2 + $0x8] sm:$0x3] %vm1061_vm9, %v2868_v16 }
  0xee   :  { %v2521_v14 = vunpack.i.h.bf16 %v2519_v58  ;;  %v2520_v50 = vunpack.i.l.bf16 %v2519_v58  ;;  %1063 = vst.msk [vmem:[#allocation2 + $0x10] sm:$0xff] %vm728_vm3, %v2868_v16 }
  0xef   :  { %v2574_v44 = vpop.permute.xlu2 %2573  ;;  %1064 = vst.msk [vmem:[#allocation2 + $0x18] sm:$0x3] %vm1061_vm9, %v2868_v16 }
  0xf0   :  { %v725_v61 = vsel %vm711_vm2, %v3185_v29, %v2521_v14  ;;  %v724_v11 = vsel %vm711_vm2, %v3157_v12, %v2520_v50  ;;  %v2576_v32 = vunpack.i.h.bf16 %v2574_v44  ;;  %v2575_v24 = vunpack.i.l.bf16 %v2574_v44  ;;  %1065 = vst.msk [vmem:[#allocation2 + $0x20] sm:$0xff] %vm728_vm3, %v2868_v16 }
  0xf1   :  { %v2539_v2 = vpop.permute.xlu1 %2538  ;;  %v741_v57 = vsel %vm728_vm3, %v724_v11, %v2525_v53  ;;  %v742_v33 = vsel %vm728_vm3, %v725_v61, %v2526_v26  ;;  %1066 = vst.msk [vmem:[#allocation2 + $0x28] sm:$0x3] %vm1061_vm9, %v2868_v16 }
  0xf2   :  { %v758_v39 = vsel %vm745_vm4, %v741_v57, %v2530_v37  ;;  %v759_v34 = vsel %vm745_vm4, %v742_v33, %v2531_v36  ;;  %v2541_v48 = vunpack.i.h.bf16 %v2539_v2  ;;  %v2540_v1 = vunpack.i.l.bf16 %v2539_v2  ;;  %1069 = vst.msk [vmem:[#allocation2 + $0x40] sm:$0xff] %vm728_vm3, %v2868_v16  ;;  %v1009_v33 = vpop.f32.mrf.mxu1 }
  0xf3   :  { %1070 = vst.msk [vmem:[#allocation2 + $0x48] sm:$0x3] %vm1061_vm9, %v2868_v16 }
  0xf4   :  { %1071 = vst.msk [vmem:[#allocation2 + $0x50] sm:$0xff] %vm728_vm3, %v2868_v16 }
  0xf5   :  { %v2534_v20 = vpop.permute.xlu0 %2533  ;;  %1072 = vst.msk [vmem:[#allocation2 + $0x58] sm:$0x3] %vm1061_vm9, %v2868_v16 }
  0xf6   :  { %v2536_v54 = vunpack.i.h.bf16 %v2534_v20  ;;  %v2535_v9 = vunpack.i.l.bf16 %v2534_v20  ;;  %1073 = vst.msk [vmem:[#allocation2 + $0x60] sm:$0xff] %vm728_vm3, %v2868_v16  ;;  %v3565_v20 = vld [vmem:[%s4274_s2] ss:$0 sm:$0xff] }
  0xf7   :  { %1074 = vst.msk [vmem:[#allocation2 + $0x68] sm:$0x3] %vm1061_vm9, %v2868_v16 }
  0xf8   :  { %v775_v40 = vsel %vm762_vm5, %v758_v39, %v2535_v9  ;;  %v776_v12 = vsel %vm762_vm5, %v759_v34, %v2536_v54  ;;  %1075 = vst.msk [vmem:[#allocation2 + $0x70] sm:$0xff] %vm728_vm3, %v2868_v16 }
  0xf9   :  { %v2554_v29 = vpop.permute.xlu1 %2553  ;;  %v792_v17 = vsel %vm779_vm6, %v775_v40, %v2540_v1  ;;  %v793_v23 = vsel %vm779_vm6, %v776_v12, %v2541_v48  ;;  %1076 = vst.msk [vmem:[#allocation2 + $0x78] sm:$0x3] %vm1061_vm9, %v2868_v16 }
  0xfa   :  { %v809_v27 = vsel %vm796_vm7, %v792_v17, %v2545_v5  ;;  %v810_v30 = vsel %vm796_vm7, %v793_v23, %v2546_v59  ;;  %v2556_v46 = vunpack.i.h.bf16 %v2554_v29  ;;  %v2555_v4 = vunpack.i.l.bf16 %v2554_v29  ;;  %1077 = vst.msk [vmem:[#allocation2 + $0x80] sm:$0xff] %vm728_vm3, %v2868_v16  ;;  %v1011_v48 = vpop.f32.mrf.mxu1 }
  0xfb   :  { %1078 = vst.msk [vmem:[#allocation2 + $0x88] sm:$0x3] %vm1061_vm9, %v2868_v16 }
  0xfc   :  { %v727_v38 = vsel %vm711_vm2, %v3244_v22, %v2556_v46  ;;  %v726_v15 = vsel %vm711_vm2, %v3224_v0, %v2555_v4  ;;  %1079 = vst.msk [vmem:[#allocation2 + $0x90] sm:$0xff] %vm728_vm3, %v2868_v16 }
  0xfd   :  { %v2549_v52 = vpop.permute.xlu0 %2548  ;;  %v743_v18 = vsel %vm728_vm3, %v726_v15, %v2560_v60  ;;  %v744_v19 = vsel %vm728_vm3, %v727_v38, %v2561_v13  ;;  %1080 = vst.msk [vmem:[#allocation2 + $0x98] sm:$0x3] %vm1061_vm9, %v2868_v16 }
  0xfe   :  { %v2551_v35 = vunpack.i.h.bf16 %v2549_v52  ;;  %v2550_v49 = vunpack.i.l.bf16 %v2549_v52  ;;  %1081 = vst.msk [vmem:[#allocation2 + $0xa0] sm:$0xff] %vm728_vm3, %v2868_v16 }
  0xff   :  { %1082 = vst.msk [vmem:[#allocation2 + $0xa8] sm:$0x3] %vm1061_vm9, %v2868_v16 }
 0x100   :  { %v826_v56 = vsel %vm813_vm8, %v809_v27, %v2550_v49  ;;  %v827_v21 = vsel %vm813_vm8, %v810_v30, %v2551_v35  ;;  %1083 = vst.msk [vmem:[#allocation2 + $0xb0] sm:$0xff] %vm728_vm3, %v2868_v16 }
 0x101   :  { %v2569_v28 = vpop.permute.xlu1 %2568  ;;  %v842_v25 = vpack.c.bf16 %v827_v21, %v826_v56  ;;  %1084 = vst.msk [vmem:[#allocation2 + $0xb8] sm:$0x3] %vm1061_vm9, %v2868_v16 }
 0x102   :  { %v2571_v10 = vunpack.i.h.bf16 %v2569_v28  ;;  %v2570_v41 = vunpack.i.l.bf16 %v2569_v28  ;;  %1085 = vst.msk [vmem:[#allocation2 + $0xc0] sm:$0xff] %vm728_vm3, %v2868_v16 }
 0x103   :  { %984 = vmatmul.bf16.gmra.mxu0 %v842_v25  ;;  %1086 = vst.msk [vmem:[#allocation2 + $0xc8] sm:$0x3] %vm1061_vm9, %v2868_v16 }
 0x104   :  { %1087 = vst.msk [vmem:[#allocation2 + $0xd0] sm:$0xff] %vm728_vm3, %v2868_v16 }
 0x105   :  { %v2564_v51 = vpop.permute.xlu0 %2563  ;;  %1088 = vst.msk [vmem:[#allocation2 + $0xd8] sm:$0x3] %vm1061_vm9, %v2868_v16 }
 0x106   :  { %v2566_v62 = vunpack.i.h.bf16 %v2564_v51  ;;  %v2565_v8 = vunpack.i.l.bf16 %v2564_v51  ;;  %1089 = vst.msk [vmem:[#allocation2 + $0xe0] sm:$0xff] %vm728_vm3, %v2868_v16 }
 0x107   :  { %1090 = vst.msk [vmem:[#allocation2 + $0xe8] sm:$0x3] %vm1061_vm9, %v2868_v16 }
 0x108   :  { %v761_v0 = vsel %vm745_vm4, %v744_v19, %v2566_v62  ;;  %v760_v22 = vsel %vm745_vm4, %v743_v18, %v2565_v8  ;;  %1091 = vst.msk [vmem:[#allocation2 + $0xf0] sm:$0xff] %vm728_vm3, %v2868_v16 }
 0x109   :  { %v2584_v47 = vpop.permute.xlu1 %2583  ;;  %v777_v31 = vsel %vm762_vm5, %v760_v22, %v2570_v41  ;;  %v778_v63 = vsel %vm762_vm5, %v761_v0, %v2571_v10  ;;  %1092 = vst.msk [vmem:[#allocation2 + $0xf8] sm:$0x3] %vm1061_vm9, %v2868_v16 }
 0x10a   :  { %v2586_v6 = vunpack.i.h.bf16 %v2584_v47  ;;  %v2585_v14 = vunpack.i.l.bf16 %v2584_v47  ;;  %v794_v2 = vsel %vm779_vm6, %v777_v31, %v2575_v24  ;;  %v795_v26 = vsel %vm779_vm6, %v778_v63, %v2576_v32  ;;  %1093 = vst.msk [vmem:[#allocation2 + $0x100] sm:$0xff] %vm728_vm3, %v2868_v16 }
 0x10b   :  { %1094 = vst.msk [vmem:[#allocation2 + $0x108] sm:$0x3] %vm1061_vm9, %v2868_v16 }
 0x10c   :  { %1095 = vst.msk [vmem:[#allocation2 + $0x110] sm:$0xff] %vm728_vm3, %v2868_v16 }
 0x10d   :  { %v2579_v58 = vpop.permute.xlu0 %2578  ;;  %1096 = vst.msk [vmem:[#allocation2 + $0x118] sm:$0x3] %vm1061_vm9, %v2868_v16  ;;  %v1014_v29 = vpop.f32.mrf.mxu1 }
 0x10e   :  { %v2581_v50 = vunpack.i.h.bf16 %v2579_v58  ;;  %v2580_v3 = vunpack.i.l.bf16 %v2579_v58  ;;  %1097 = vst.msk [vmem:[#allocation2 + $0x120] sm:$0xff] %vm728_vm3, %v2868_v16 }
 0x10f   :  { %1098 = vst.msk [vmem:[#allocation2 + $0x128] sm:$0x3] %vm1061_vm9, %v2868_v16 }
 0x110   :  { %v3522_v53 = vpop.f32.mrf.mxu0  ;;  %v811_v61 = vsel %vm796_vm7, %v794_v2, %v2580_v3  ;;  %v812_v11 = vsel %vm796_vm7, %v795_v26, %v2581_v50  ;;  %1099 = vst.msk [vmem:[#allocation2 + $0x130] sm:$0xff] %vm728_vm3, %v2868_v16 }
 0x111   :  { %v828_v36 = vsel %vm813_vm8, %v811_v61, %v2585_v14  ;;  %v829_v37 = vsel %vm813_vm8, %v812_v11, %v2586_v6  ;;  %1100 = vst.msk [vmem:[#allocation2 + $0x138] sm:$0x3] %vm1061_vm9, %v2868_v16 }
 0x112   :  { %v844_v7 = vpack.c.bf16 %v829_v37, %v828_v36 }
 0x114   :  { %989 = vmatmul.bf16.gmra.mxu0 %v844_v7 }
 0x115   :  { %v1016_v23 = vpop.f32.mrf.mxu1 }
 0x118   :  { %v3544_v57 = vpop.f32.mrf.mxu0 }
 0x121   :  { %v960_v54 = vpop.f32.mrf.mxu0  ;;  %v1019_v55 = vpop.f32.mrf.mxu2 }
 0x122   :  { %v961_v9 = vadd.f32 %v3565_v20, %v960_v54 }
 0x124   :  { %v1010_v39 = vadd.f32 %v1009_v33, %v961_v9  ;;  %2181 = vmatmul.msk.bf16.vlgmr.msrb.gmra.mxu0 %vm711_vm2, %v831_v45  ;;  %v2295_v9 = vld [vmem:[%s4275_s3 + $0x88] sm:$0xff] }
 0x125   :  { %2030 = vmatpush.bf16.msrb.mxu1 %v2295_v9 }
 0x126   :  { %v1046_v34 = vmax.f32 %v1010_v39, 0.0 }
 0x128   :  { %1104 = vst.msk [vmem:[#allocation2 + $0x31] sm:$0xff] %vm728_vm3, %v1046_v34  ;;  %v2294_v34 = vld [vmem:[%s4275_s3 + $0x80] sm:$0xff] }
 0x129   :  { %v962_v1 = vpop.f32.mrf.mxu0  ;;  %v1021_v28 = vpop.f32.mrf.mxu2  ;;  %2031 = vmatpush.bf16.msrb.mxu1 %v2294_v34 }
 0x12a   :  { %v963_v42 = vadd.f32 %v3565_v20, %v962_v1 }
 0x12c   :  { %v1012_v43 = vadd.f32 %v1011_v48, %v963_v42 }
 0x12e   :  { %v1047_v45 = vmax.f32 %v1012_v43, 0.0 }
 0x130   :  { %1105 = vst.msk [vmem:[#allocation2 + $0x41] sm:$0xff] %vm728_vm3, %v1047_v45 }
 0x131   :  { %v1024_v60 = vpop.f32.mrf.mxu2 }
 0x132   :  { %v965_v40 = vpop.f32.mrf.mxu0 }
 0x133   :  { %v966_v12 = vadd.f32 %v3565_v20, %v965_v40  ;;  %v956_v40 = vadd.f32 %v3565_v20, %v3522_v53 }
 0x135   :  { %v1015_v59 = vadd.f32 %v1014_v29, %v966_v12  ;;  %v1029_v41 = vpop.f32.mrf.mxu3 }
 0x137   :  { %v1048_v5 = vmax.f32 %v1015_v59, 0.0 }
 0x139   :  { %1106 = vst.msk [vmem:[#allocation2 + $0x51] sm:$0xff] %vm728_vm3, %v1048_v5  ;;  %v1026_v16 = vpop.f32.mrf.mxu2 }
 0x13a   :  { %v967_v17 = vpop.f32.mrf.mxu0 }
 0x13b   :  { %v968_v52 = vadd.f32 %v3565_v20, %v967_v17  ;;  %v3638_v17 = vld [vmem:[#allocation2] sm:$0xff] }
 0x13d   :  { %v1017_v35 = vadd.f32 %v1016_v23, %v968_v52  ;;  %v1031_v24 = vpop.f32.mrf.mxu3  ;;  %v1119_v23 = vld [vmem:[#allocation2 + $0x8] sm:$0x3]  ;;  %v958_v52 = vadd.f32 %v3565_v20, %v3544_v57 }
 0x13e   :  { %v1191_v53 = vrot.slane %v1119_v23, 1 }
 0x13f   :  { %v1049_v49 = vmax.f32 %v1017_v35, 0.0 }
 0x141   :  { %1107 = vst.msk [vmem:[#allocation2 + $0x61] sm:$0xff] %vm728_vm3, %v1049_v49  ;;  %v1238_v49 = vrot.slane %v3638_v17, 2 }
 0x148   :  { %v970_v27 = vpop.f32.mrf.mxu0  ;;  %v1034_v6 = vpop.f32.mrf.mxu3 }
 0x149   :  { %v971_v30 = vadd.f32 %v3565_v20, %v970_v27  ;;  %v1190_v27 = vrot.slane %v3638_v17, 1 }
 0x14b   :  { %v1020_v56 = vadd.f32 %v1019_v55, %v971_v30  ;;  %v1239_v55 = vrot.slane %v1119_v23, 2  ;;  %v3711_v23 = vld [vmem:[#allocation2 + $0x60] sm:$0xff] }
 0x14d   :  { %v1050_v21 = vmax.f32 %v1020_v56, 0.0 }
 0x14f   :  { %1108 = vst.msk [vmem:[#allocation2 + $0x71] sm:$0xff] %vm728_vm3, %v1050_v21 }
 0x150   :  { %v972_v46 = vpop.f32.mrf.mxu0  ;;  %v1036_v26 = vpop.f32.mrf.mxu3 }
 0x151   :  { %v973_v4 = vadd.f32 %v3565_v20, %v972_v46  ;;  %v1240_v46 = vsel %vm278_vm1, %v1238_v49, %v1239_v55 }
 0x153   :  { %v1022_v25 = vadd.f32 %v1021_v28, %v973_v4  ;;  %v1192_v4 = vsel %vm133_vm0, %v1190_v27, %v1191_v53  ;;  %v1256_v53 = vrot.slane %v3711_v23, 2 }
 0x155   :  { %v1051_v13 = vmax.f32 %v1022_v25, 0.0 }
 0x156   :  { %v1133_v49 = vld [vmem:[#allocation2 + $0x78] sm:$0x3] }
 0x157   :  { %1109 = vst.msk [vmem:[#allocation2 + $0x81] sm:$0xff] %vm728_vm3, %v1051_v13 }
 0x159   :  { %v975_v38 = vpop.f32.mrf.mxu0 }
 0x15a   :  { %v976_v15 = vadd.f32 %v3565_v20, %v975_v38 }
 0x15c   :  { %v1025_v51 = vadd.f32 %v1024_v60, %v976_v15 }
 0x15d   :  { %v1039_v7 = vpop.f32.mrf.mxu3 }
 0x15e   :  { %v1052_v62 = vmax.f32 %v1025_v51, 0.0 }
 0x160   :  { %1110 = vst.msk [vmem:[#allocation2 + $0xb1] sm:$0xff] %vm728_vm3, %v1052_v62  ;;  %v3656_v62 = vld [vmem:[#allocation2 + $0x30] sm:$0xff] }
 0x161   :  { %v977_v8 = vpop.f32.mrf.mxu0 }
 0x162   :  { %v978_v18 = vadd.f32 %v3565_v20, %v977_v8  ;;  %v1125_v8 = vld [vmem:[#allocation2 + $0x38] sm:$0x3] }
 0x164   :  { %v1027_v19 = vadd.f32 %v1026_v16, %v978_v18  ;;  %v1247_v16 = vrot.slane %v3656_v62, 2  ;;  %v1248_v18 = vrot.slane %v1125_v8, 2 }
 0x165   :  { %v1041_v42 = vpop.f32.mrf.mxu3 }
 0x166   :  { %v1053_v10 = vmax.f32 %v1027_v19, 0.0  ;;  %v1199_v19 = vrot.slane %v3656_v62, 1 }
 0x168   :  { %1111 = vst.msk [vmem:[#allocation2 + $0xc1] sm:$0xff] %vm728_vm3, %v1053_v10  ;;  %v1200_v10 = vrot.slane %v1125_v8, 1 }
 0x16a   :  { %v980_v44 = vpop.f32.mrf.mxu0 }
 0x16b   :  { %v981_v0 = vadd.f32 %v3565_v20, %v980_v44 }
 0x16d   :  { %v1030_v22 = vadd.f32 %v1029_v41, %v981_v0 }
 0x16f   :  { %v1054_v47 = vmax.f32 %v1030_v22, 0.0 }
 0x171   :  { %1112 = vst.msk [vmem:[#allocation2 + $0xd1] sm:$0xff] %vm728_vm3, %v1054_v47 }
 0x172   :  { %v982_v32 = vpop.f32.mrf.mxu0 }
 0x173   :  { %v983_v31 = vadd.f32 %v3565_v20, %v982_v32 }
 0x175   :  { %v1032_v63 = vadd.f32 %v1031_v24, %v983_v31  ;;  %v1249_v31 = vsel %vm278_vm1, %v1247_v16, %v1248_v18 }
 0x177   :  { %v1055_v58 = vmax.f32 %v1032_v63, 0.0 }
 0x179   :  { %1113 = vst.msk [vmem:[#allocation2 + $0xe1] sm:$0xff] %vm728_vm3, %v1055_v58  ;;  %v3672_v58 = vsel %vm133_vm0, %v1199_v19, %v1200_v10  ;;  %v1136_v19 = vld [vmem:[#allocation2 + $0x90] sm:$0xff]  ;;  %v1137_v10 = vld [vmem:[#allocation2 + $0x98] sm:$0x3] }
 0x180   :  { %v985_v14 = vpop.f32.mrf.mxu0 }
 0x181   :  { %v986_v50 = vadd.f32 %v3565_v20, %v985_v14 }
 0x183   :  { %v1035_v3 = vadd.f32 %v1034_v6, %v986_v50 }
 0x185   :  { %v1056_v2 = vmax.f32 %v1035_v3, 0.0 }
 0x187   :  { %1114 = vst.msk [vmem:[#allocation2 + $0xf1] sm:$0xff] %vm728_vm3, %v1056_v2  ;;  %v3682_v2 = vld [vmem:[#allocation2 + $0x40] sm:$0xff] }
 0x188   :  { %v987_v61 = vpop.f32.mrf.mxu0  ;;  %v2632_v55 = vpack.i.bf16 %v3682_v2, %v3656_v62 }
 0x189   :  { %v988_v11 = vadd.f32 %v3565_v20, %v987_v61  ;;  %v3684_v61 = vld [vmem:[#allocation2 + $0x50] sm:$0xff] }
 0x18b   :  { %v1037_v36 = vadd.f32 %v1036_v26, %v988_v11  ;;  %v1127_v26 = vld [vmem:[#allocation2 + $0x48] sm:$0x3]  ;;  %v1129_v11 = vld [vmem:[#allocation2 + $0x58] sm:$0x3] }
 0x18c   :  { %v1254_v9 = vrot.slane %v1129_v11, 2  ;;  %v1206_v34 = vrot.slane %v1129_v11, 1  ;;  %v2293_v11 = vld [vmem:[%s4275_s3 + $0x78] sm:$0xff] }
 0x18d   :  { %v1057_v37 = vmax.f32 %v1037_v36, 0.0  ;;  %1975 = vmatpush.bf16.msrb.mxu3 %v2293_v11 }
 0x18f   :  { %1115 = vst.msk [vmem:[#allocation2 + $0x101] sm:$0xff] %vm728_vm3, %v1057_v37  ;;  %v1250_v37 = vrot.slane %v3682_v2, 2 }
 0x191   :  { %v990_v33 = vpop.f32.mrf.mxu0 }
 0x192   :  { %v991_v54 = vadd.f32 %v3565_v20, %v990_v33 }
 0x194   :  { %v1040_v39 = vadd.f32 %v1039_v7, %v991_v54  ;;  %v1251_v7 = vrot.slane %v1127_v26, 2  ;;  %v1253_v54 = vrot.slane %v3684_v61, 2 }
 0x196   :  { %v1058_v48 = vmax.f32 %v1040_v39, 0.0  ;;  %v1205_v39 = vrot.slane %v3684_v61, 1 }
 0x198   :  { %1116 = vst.msk [vmem:[#allocation2 + $0x111] sm:$0xff] %vm728_vm3, %v1058_v48  ;;  %v1202_v48 = vrot.slane %v3682_v2, 1 }
 0x199   :  { %v992_v1 = vpop.f32.mrf.mxu0 }
 0x19a   :  { %v993_v43 = vadd.f32 %v3565_v20, %v992_v1  ;;  %v1203_v1 = vrot.slane %v1127_v26, 1 }
 0x19c   :  { %v1042_v45 = vadd.f32 %v1041_v42, %v993_v43  ;;  %v1252_v42 = vsel %vm278_vm1, %v1250_v37, %v1251_v7  ;;  %v1255_v43 = vsel %vm278_vm1, %v1253_v54, %v1254_v9  ;;  %v1139_v37 = vld [vmem:[#allocation2 + $0xa8] sm:$0x3] }
 0x19d   :  { %v2657_v27 = vpack.i.bf16 %v1255_v43, %v1252_v42 }
 0x19e   :  { %v1059_v29 = vmax.f32 %v1042_v45, 0.0  ;;  %v3698_v45 = vsel %vm133_vm0, %v1205_v39, %v1206_v34  ;;  %v3756_v39 = vld [vmem:[#allocation2 + $0xb0] sm:$0xff]  ;;  %v1141_v34 = vld [vmem:[#allocation2 + $0xb8] sm:$0x3] }
 0x1a0   :  { %1117 = vst.msk [vmem:[#allocation2 + $0x121] sm:$0xff] %vm728_vm3, %v1059_v29  ;;  %v1739_v29 = vpack.c.bf16 %v1255_v43, %v1252_v42 }
 0x1a1   :  { %v1004_v12 = vpop.f32.mrf.mxu0 }
 0x1a2   :  { %v1005_v59 = vadd.f32 %v1004_v12, %v956_v40  ;;  %v2612_v40 = vpack.i.bf16 %v1252_v42, %v1249_v31  ;;  %v3701_v12 = vsel %vm133_vm0, %v1202_v48, %v1203_v1  ;;  %v1263_v1 = vrot.slane %v1139_v37, 2 }
 0x1a4   :  { %v1044_v5 = vmax.f32 %v1005_v59, 0.0  ;;  %v2642_v59 = vpack.i.bf16 %v3698_v45, %v3701_v12 }
 0x1a6   :  { %1102 = vst.msk [vmem:[#allocation2 + $0x11] sm:$0xff] %vm728_vm3, %v1044_v5  ;;  %v2627_v5 = vpack.i.bf16 %v3684_v61, %v3682_v2 }
 0x1a9   :  { %v1006_v35 = vpop.f32.mrf.mxu0 }
 0x1aa   :  { %v1007_v30 = vadd.f32 %v1006_v35, %v958_v52  ;;  %v1131_v52 = vld [vmem:[#allocation2 + $0x68] sm:$0x3]  ;;  %v3713_v35 = vld [vmem:[#allocation2 + $0x70] sm:$0xff] }
 0x1ab   :  { %v2662_v18 = vpack.i.bf16 %v3713_v35, %v3711_v23 }
 0x1ac   :  { %v1045_v56 = vmax.f32 %v1007_v30, 0.0  ;;  %v1257_v30 = vrot.slane %v1131_v52, 2 }
 0x1ad   :  { %v3644_v21 = vld [vmem:[#allocation2 + $0x10] sm:$0xff]  ;;  %v1121_v28 = vld [vmem:[#allocation2 + $0x18] sm:$0x3] }
 0x1ae   :  { %1103 = vst.msk [vmem:[#allocation2 + $0x21] sm:$0xff] %vm728_vm3, %v1045_v56  ;;  %v1241_v57 = vrot.slane %v3644_v21, 2  ;;  %v1242_v20 = vrot.slane %v1121_v28, 2  ;;  %v1193_v25 = vrot.slane %v3644_v21, 1  ;;  %v1194_v13 = vrot.slane %v1121_v28, 1 }
 0x1af   :  { %v1259_v56 = vrot.slane %v3713_v35, 2  ;;  %v1260_v28 = vrot.slane %v1133_v49, 2 }
 0x1b0   :  { %v1243_v60 = vsel %vm278_vm1, %v1241_v57, %v1242_v20  ;;  %v3653_v38 = vsel %vm133_vm0, %v1193_v25, %v1194_v13  ;;  %v1208_v57 = vrot.slane %v3711_v23, 1  ;;  %v1209_v20 = vrot.slane %v1131_v52, 1 }
 0x1b1   :  { %v2592_v15 = vpack.i.bf16 %v1243_v60, %v1240_v46  ;;  %v2587_v51 = vpack.i.bf16 %v3653_v38, %v1192_v4  ;;  %v1211_v46 = vrot.slane %v3713_v35, 1  ;;  %v1212_v4 = vrot.slane %v1133_v49, 1 }
 0x1b2   :  { %v1258_v25 = vsel %vm278_vm1, %v1256_v53, %v1257_v30  ;;  %v1261_v13 = vsel %vm278_vm1, %v1259_v56, %v1260_v28  ;;  %v3730_v8 = vsel %vm133_vm0, %v1208_v57, %v1209_v20  ;;  %v1265_v52 = vrot.slane %v3756_v39, 2  ;;  %v3775_v57 = vld [vmem:[#allocation2 + $0xd0] sm:$0xff]  ;;  %v1145_v20 = vld [vmem:[#allocation2 + $0xd8] sm:$0x3] }
 0x1b3   :  { %2593 = vrot.lane.b32.xlu1 %v2592_v15, %s2863_s15  ;;  %2588 = vrot.lane.b32.xlu2 %v2587_v51, %s2865_s17  ;;  %v1742_v15 = vpack.c.bf16 %v1261_v13, %v1258_v25  ;;  %v2652_v51 = vpack.i.bf16 %v1258_v25, %v1255_v43  ;;  %v1215_v43 = vrot.slane %v1139_v37, 1  ;;  %v1266_v49 = vrot.slane %v1141_v34, 2 }
 0x1b5   :  { %v3662_v41 = vld [vmem:[#allocation2 + $0x20] sm:$0xff]  ;;  %v1123_v44 = vld [vmem:[#allocation2 + $0x28] sm:$0x3]  ;;  %v1267_v30 = vsel %vm278_vm1, %v1265_v52, %v1266_v49 }
 0x1b6   :  { %v1244_v0 = vrot.slane %v3662_v41, 2  ;;  %v1245_v22 = vrot.slane %v1123_v44, 2  ;;  %v1196_v47 = vrot.slane %v3662_v41, 1  ;;  %v1197_v32 = vrot.slane %v1123_v44, 1  ;;  %v1134_v44 = vld [vmem:[#allocation2 + $0x80] sm:$0xff] }
 0x1b7   :  { %v2597_v3 = vpack.i.bf16 %v3656_v62, %v3662_v41  ;;  %v2607_v36 = vpack.i.bf16 %v3662_v41, %v3644_v21 }
 0x1b8   :  { %v1246_v24 = vsel %vm278_vm1, %v1244_v0, %v1245_v22  ;;  %v3669_v63 = vsel %vm133_vm0, %v1196_v47, %v1197_v32  ;;  %v1135_v0 = vld [vmem:[#allocation2 + $0x88] sm:$0x3]  ;;  %v1328_v22 = vrot.slane %v1136_v19, 2  ;;  %v1329_v47 = vrot.slane %v1137_v10, 2 }
 0x1b9   :  { %v1736_v6 = vpack.c.bf16 %v1249_v31, %v1246_v24  ;;  %v2602_v14 = vpack.i.bf16 %v1246_v24, %v1243_v60  ;;  %v2617_v50 = vpack.i.bf16 %v3672_v58, %v3669_v63  ;;  %v2637_v33 = vpack.i.bf16 %v1249_v31, %v1246_v24 }
 0x1ba   :  { %v3727_v60 = vsel %vm133_vm0, %v1211_v46, %v1212_v4  ;;  %v1322_v32 = vrot.slane %v1136_v19, 1  ;;  %v2667_v24 = vpack.i.bf16 %v3711_v23, %v3684_v61  ;;  %v2687_v31 = vpack.i.bf16 %v1261_v13, %v1258_v25  ;;  %v3773_v46 = vld [vmem:[#allocation2 + $0xc0] sm:$0xff]  ;;  %v1143_v4 = vld [vmem:[#allocation2 + $0xc8] sm:$0x3]  ;;  %v2292_v25 = vld [vmem:[%s4275_s3 + $0x70] sm:$0xff] }
 0x1bb   :  { %2261 = vmatmul.msk.bf16.vlgmr.msrb.gmra.mxu1 %vm728_vm3, %v1736_v6  ;;  %2603 = vrot.lane.b32.xlu0 %v2602_v14, %s2865_s17  ;;  %v2672_v16 = vpack.i.bf16 %v3727_v60, %v3730_v8  ;;  %v1323_v6 = vrot.slane %v1137_v10, 1  ;;  %v1312_v14 = vrot.slane %v1134_v44, 2  ;;  %v1291_v26 = vrot.slane %v1135_v0, 1 }
 0x1bc   :  { %2618 = vrot.lane.b32.xlu1 %v2617_v50, %s2866_s22  ;;  %2598 = vrot.lane.b32.xlu2 %v2597_v3, %s2863_s15  ;;  %v1290_v3 = vrot.slane %v1134_v44, 1  ;;  %v1272_v10 = vrot.slane %v1145_v20, 2  ;;  %v2722_v37 = vpack.i.bf16 %v3775_v57, %v3773_v46 }
 0x1bd   :  { %v1324_v9 = vsel %vm133_vm0, %v1322_v32, %v1323_v6  ;;  %1976 = vmatpush.bf16.msrb.mxu3 %v2292_v25  ;;  %v2291_v6 = vld [vmem:[%s4275_s3 + $0x68] sm:$0xff]  ;;  %v2282_v25 = vld [vmem:[%s4275_s3 + $0x20] sm:$0xff] }
 0x1be   :  { %v3753_v54 = vsel %vm133_vm0, %v1290_v3, %v1291_v26 }
 0x1c1   :  { %1977 = vmatpush.bf16.msrb.mxu3 %v2291_v6  ;;  %v2280_v6 = vld [vmem:[%s4275_s3 + $0x10] sm:$0xff] }
 0x1c3   :  { %2608 = vrot.lane.b32.xlu0 %v2607_v36, %s2866_s22  ;;  %v3748_v36 = vld [vmem:[#allocation2 + $0xa0] sm:$0xff] }
 0x1c4   :  { %2638 = vrot.lane.b32.xlu1 %v2637_v33, %s2863_s15  ;;  %2623 = vrot.lane.b32.xlu2 %v2617_v50, %s2865_s17  ;;  %v1313_v50 = vrot.slane %v1135_v0, 2  ;;  %v1330_v33 = vsel %vm278_vm1, %v1328_v22, %v1329_v47  ;;  %v1262_v48 = vrot.slane %v3748_v36, 2  ;;  %v1214_v42 = vrot.slane %v3748_v36, 1 }
 0x1c5   :  { %v1223_v0 = vrot.slane %v3775_v57, 1  ;;  %v1224_v22 = vrot.slane %v1145_v20, 1  ;;  %v1221_v47 = vrot.slane %v1143_v4, 1 }
 0x1c6   :  { %v1314_v7 = vsel %vm278_vm1, %v1312_v14, %v1313_v50  ;;  %v1264_v53 = vsel %vm278_vm1, %v1262_v48, %v1263_v1  ;;  %v1216_v56 = vsel %vm133_vm0, %v1214_v42, %v1215_v43  ;;  %v2285_v14 = vld [vmem:[%s4275_s3 + $0x38] sm:$0xff]  ;;  %v2284_v1 = vld [vmem:[%s4275_s3 + $0x30] sm:$0xff]  ;;  %v2727_v42 = vpack.i.bf16 %v3773_v46, %v3756_v39 }
 0x1c7   :  { %1926 = vmatpush.bf16.msrb.mxu2 %v2285_v14  ;;  %v1149_v48 = vld [vmem:[#allocation2 + $0xf8] sm:$0x3] }
 0x1c8   :  { %v1278_v49 = vrot.slane %v1149_v48, 2 }
 0x1cb   :  { %2262 = vmatmul.msk.bf16.gmra.mxu1 %vm728_vm3, %v1739_v29  ;;  %2613 = vrot.lane.b32.xlu0 %v2612_v40, %s2865_s17  ;;  %v1745_v29 = vpack.c.bf16 %v1330_v33, %v1314_v7  ;;  %v2682_v40 = vpack.i.bf16 %v1314_v7, %v1261_v13  ;;  %v2697_v13 = vpack.i.bf16 %v1134_v44, %v3713_v35  ;;  %v2290_v7 = vld [vmem:[%s4275_s3 + $0x60] sm:$0xff] }
 0x1cc   :  { %2643 = vrot.lane.b32.xlu1 %v2642_v59, %s2866_s22  ;;  %2628 = vrot.lane.b32.xlu2 %v2627_v5, %s2863_s15  ;;  %v2692_v5 = vpack.i.bf16 %v1136_v19, %v1134_v44  ;;  %v1271_v19 = vrot.slane %v3775_v57, 2  ;;  %v1220_v44 = vrot.slane %v3773_v46, 1  ;;  %v3814_v33 = vld [vmem:[#allocation2 + $0xe0] sm:$0xff] }
 0x1cd   :  { %1978 = vmatpush.bf16.msrb.mxu3 %v2290_v7  ;;  %1927 = vmatpush.bf16.msrb.mxu2 %v2284_v1  ;;  %v2757_v14 = vpack.i.bf16 %v3814_v33, %v3775_v57 }
 0x1ce   :  { %v3801_v26 = vsel %vm133_vm0, %v1220_v44, %v1221_v47  ;;  %v3866_v44 = vld [vmem:[#allocation2 + $0x100] sm:$0xff]  ;;  %v1151_v47 = vld [vmem:[#allocation2 + $0x108] sm:$0x3] }
 0x1cf   :  { %v1281_v7 = vrot.slane %v1151_v47, 2 }
 0x1d3   :  { %2633 = vrot.lane.b32.xlu0 %v2632_v55, %s2866_s22  ;;  %v1217_v55 = vrot.slane %v3756_v39, 1 }
 0x1d4   :  { %2658 = vrot.lane.b32.xlu1 %v2657_v27, %s2863_s15  ;;  %2648 = vrot.lane.b32.xlu2 %v2642_v59, %s2865_s17  ;;  %v2702_v59 = vpack.i.bf16 %v1324_v9, %v3753_v54  ;;  %v1218_v27 = vrot.slane %v1141_v34, 1  ;;  %v1147_v9 = vld [vmem:[#allocation2 + $0xe8] sm:$0x3]  ;;  %v3816_v34 = vld [vmem:[#allocation2 + $0xf0] sm:$0xff] }
 0x1d5   :  { %v1277_v52 = vrot.slane %v3816_v34, 2 }
 0x1d6   :  { %v3771_v28 = vsel %vm133_vm0, %v1217_v55, %v1218_v27  ;;  %v1229_v55 = vrot.slane %v3816_v34, 1  ;;  %v1230_v27 = vrot.slane %v1149_v48, 1 }
 0x1d8   :  { %v3839_v20 = vsel %vm133_vm0, %v1229_v55, %v1230_v27 }
 0x1db   :  { %2263 = vmatmul.msk.bf16.gmra.mxu1 %vm728_vm3, %v1742_v15  ;;  %2653 = vrot.lane.b32.xlu0 %v2652_v51, %s2865_s17  ;;  %v2717_v15 = vpack.i.bf16 %v1267_v30, %v1264_v53  ;;  %v2707_v51 = vpack.i.bf16 %v3771_v28, %v1216_v56  ;;  %v1226_v53 = vrot.slane %v3814_v33, 1 }
 0x1dc   :  { %2673 = vrot.lane.b32.xlu1 %v2672_v16, %s2866_s22  ;;  %2663 = vrot.lane.b32.xlu2 %v2662_v18, %s2863_s15  ;;  %v1269_v18 = vrot.slane %v1143_v4, 2  ;;  %v1279_v4 = vsel %vm278_vm1, %v1277_v52, %v1278_v49  ;;  %v2278_v49 = vld [vmem:[%s4275_s3] sm:$0xff] }
 0x1e3   :  { %2668 = vrot.lane.b32.xlu0 %v2667_v24, %s2866_s22  ;;  %v1273_v24 = vsel %vm278_vm1, %v1271_v19, %v1272_v10  ;;  %v2752_v10 = vpack.i.bf16 %v3816_v34, %v3814_v33 }
 0x1e4   :  { %2688 = vrot.lane.b32.xlu1 %v2687_v31, %s2863_s15  ;;  %2678 = vrot.lane.b32.xlu2 %v2672_v16, %s2865_s17  ;;  %v1268_v16 = vrot.slane %v3773_v46, 2  ;;  %v3792_v31 = vsel %vm133_vm0, %v1223_v0, %v1224_v22  ;;  %v2287_v22 = vld [vmem:[%s4275_s3 + $0x48] sm:$0xff] }
 0x1e5   :  { %v2732_v11 = vpack.i.bf16 %v3792_v31, %v3801_v26 }
 0x1e6   :  { %v1270_v32 = vsel %vm278_vm1, %v1268_v16, %v1269_v18  ;;  %v2281_v18 = vld [vmem:[%s4275_s3 + $0x18] sm:$0xff] }
 0x1e7   :  { %v1748_v50 = vpack.c.bf16 %v1273_v24, %v1270_v32  ;;  %v2712_v3 = vpack.i.bf16 %v1270_v32, %v1267_v30  ;;  %v2747_v43 = vpack.i.bf16 %v1273_v24, %v1270_v32  ;;  %v1227_v30 = vrot.slane %v1147_v9, 1  ;;  %v3868_v32 = vld [vmem:[#allocation2 + $0x110] sm:$0xff] }
 0x1e8   :  { %v1235_v1 = vrot.slane %v3868_v32, 1 }
 0x1e9   :  { %v3848_v16 = vsel %vm133_vm0, %v1226_v53, %v1227_v30 }
 0x1ea   :  { %v2762_v19 = vpack.i.bf16 %v3839_v20, %v3848_v16 }
 0x1eb   :  { %2264 = vmatmul.msk.bf16.gmra.mxu1 %vm728_vm3, %v1745_v29  ;;  %2683 = vrot.lane.b32.xlu0 %v2682_v40, %s2865_s17  ;;  %v2283_v29 = vld [vmem:[%s4275_s3 + $0x28] sm:$0xff]  ;;  %v2289_v40 = vld [vmem:[%s4275_s3 + $0x58] sm:$0xff] }
 0x1ec   :  { %2703 = vrot.lane.b32.xlu1 %v2702_v59, %s2866_s22  ;;  %2693 = vrot.lane.b32.xlu2 %v2692_v5, %s2863_s15  ;;  %v1274_v59 = vrot.slane %v3814_v33, 2  ;;  %v1275_v5 = vrot.slane %v1147_v9, 2  ;;  %v1283_v9 = vrot.slane %v3868_v32, 2 }
 0x1ed   :  { %1979 = vmatpush.bf16.msrb.mxu3 %v2289_v40  ;;  %1928 = vmatpush.bf16.msrb.mxu2 %v2283_v29  ;;  %v1233_v29 = vrot.slane %v1151_v47, 1 }
 0x1ee   :  { %v1276_v56 = vsel %vm278_vm1, %v1274_v59, %v1275_v5 }
 0x1f1   :  { %1929 = vmatpush.bf16.msrb.mxu2 %v2282_v25 }
 0x1f3   :  { %2698 = vrot.lane.b32.xlu0 %v2697_v13, %s2866_s22  ;;  %v2288_v13 = vld [vmem:[%s4275_s3 + $0x50] sm:$0xff] }
 0x1f4   :  { %2718 = vrot.lane.b32.xlu1 %v2717_v15, %s2863_s15  ;;  %2708 = vrot.lane.b32.xlu2 %v2707_v51, %s2865_s17  ;;  %v1751_v15 = vpack.c.bf16 %v1279_v4, %v1276_v56  ;;  %v2742_v51 = vpack.i.bf16 %v1276_v56, %v1273_v24  ;;  %v1153_v24 = vld [vmem:[#allocation2 + $0x118] sm:$0x3] }
 0x1f5   :  { %1980 = vmatpush.bf16.msrb.mxu3 %v2288_v13  ;;  %1930 = vmatpush.bf16.msrb.mxu2 %v2281_v18  ;;  %v1284_v48 = vrot.slane %v1153_v24, 2  ;;  %v1157_v13 = vld [vmem:[#allocation2 + $0x138] sm:$0x3]  ;;  %v2787_v18 = vpack.i.bf16 %v3866_v44, %v3816_v34 }
 0x1f7   :  { %v1285_v5 = vsel %vm278_vm1, %v1283_v9, %v1284_v48 }
 0x1f9   :  { %1981 = vmatpush.bf16.msrb.mxu3 %v2287_v22  ;;  %1931 = vmatpush.bf16.msrb.mxu2 %v2280_v6 }
 0x1fb   :  { %2265 = vmatmul.msk.bf16.gmra.mxu1 %vm728_vm3, %v1748_v50  ;;  %2713 = vrot.lane.b32.xlu0 %v2712_v3, %s2865_s17  ;;  %v2777_v50 = vpack.i.bf16 %v1279_v4, %v1276_v56  ;;  %v2286_v3 = vld [vmem:[%s4275_s3 + $0x40] sm:$0xff]  ;;  %v2782_v56 = vpack.i.bf16 %v3868_v32, %v3866_v44 }
 0x1fc   :  { %2733 = vrot.lane.b32.xlu1 %v2732_v11, %s2866_s22  ;;  %2723 = vrot.lane.b32.xlu2 %v2722_v37, %s2863_s15  ;;  %v1280_v37 = vrot.slane %v3866_v44, 2 }
 0x1fd   :  { %1982 = vmatpush.bf16.msrb.mxu3 %v2286_v3  ;;  %v1326_v3 = vrot.slane %v1157_v13, 1 }
 0x1fe   :  { %v1282_v59 = vsel %vm278_vm1, %v1280_v37, %v1281_v7 }
 0x1ff   :  { %v1754_v55 = vpack.c.bf16 %v1285_v5, %v1282_v59  ;;  %v2772_v27 = vpack.i.bf16 %v1282_v59, %v1279_v4  ;;  %v1156_v4 = vld [vmem:[#allocation2 + $0x130] sm:$0xff]  ;;  %v2807_v22 = vpack.i.bf16 %v1285_v5, %v1282_v59 }
 0x203   :  { %2728 = vrot.lane.b32.xlu0 %v2727_v42, %s2866_s22  ;;  %v1236_v42 = vrot.slane %v1153_v24, 1 }
 0x204   :  { %2748 = vrot.lane.b32.xlu1 %v2747_v43, %s2863_s15  ;;  %2738 = vrot.lane.b32.xlu2 %v2732_v11, %s2865_s17  ;;  %v2279_v11 = vld [vmem:[%s4275_s3 + $0x8] sm:$0xff]  ;;  %v1232_v43 = vrot.slane %v3866_v44, 1 }
 0x205   :  { %1932 = vmatpush.bf16.msrb.mxu2 %v2279_v11  ;;  %v3891_v52 = vsel %vm133_vm0, %v1235_v1, %v1236_v42 }
 0x206   :  { %v3897_v53 = vsel %vm133_vm0, %v1232_v43, %v1233_v29 }
 0x207   :  { %v2792_v30 = vpack.i.bf16 %v3891_v52, %v3897_v53 }
 0x209   :  { %1933 = vmatpush.bf16.msrb.mxu2 %v2278_v49 }
 0x20b   :  { %2266 = vmatmul.msk.bf16.gmra.mxu1 %vm728_vm3, %v1751_v15  ;;  %2743 = vrot.lane.b32.xlu0 %v2742_v51, %s2865_s17  ;;  %v1154_v15 = vld [vmem:[#allocation2 + $0x120] sm:$0xff]  ;;  %v1155_v51 = vld [vmem:[#allocation2 + $0x128] sm:$0x3] }
 0x20c   :  { %2763 = vrot.lane.b32.xlu1 %v2762_v19, %s2866_s22  ;;  %2753 = vrot.lane.b32.xlu2 %v2752_v10, %s2863_s15  ;;  %v1332_v10 = vrot.slane %v1157_v13, 2  ;;  %v1315_v47 = vrot.slane %v1154_v15, 2  ;;  %v1316_v24 = vrot.slane %v1155_v51, 2  ;;  %v1293_v6 = vrot.slane %v1154_v15, 1 }
 0x20d   :  { %v3861_v0 = vpop.permute.xlu2 %2588  ;;  %v2812_v59 = vpack.i.bf16 %v1156_v4, %v1154_v15 }
 0x20e   :  { %v1317_v7 = vsel %vm278_vm1, %v1315_v47, %v1316_v24  ;;  %v2591_v24 = vunpack.i.h.bf16 %v3861_v0 }
 0x20f   :  { %v2802_v43 = vpack.i.bf16 %v1317_v7, %v1285_v5 }
 0x213   :  { %2758 = vrot.lane.b32.xlu0 %v2757_v14, %s2866_s22  ;;  %v1294_v14 = vrot.slane %v1155_v51, 1 }
 0x214   :  { %2778 = vrot.lane.b32.xlu1 %v2777_v50, %s2863_s15  ;;  %2768 = vrot.lane.b32.xlu2 %v2762_v19, %s2865_s17  ;;  %v1331_v19 = vrot.slane %v1156_v4, 2  ;;  %v1325_v50 = vrot.slane %v1156_v4, 1 }
 0x215   :  { %v3919_v48 = vsel %vm133_vm0, %v1293_v6, %v1294_v14  ;;  %v2590_v6 = vunpack.i.l.bf16 %v3861_v0 }
 0x216   :  { %v2599_v40 = vpop.permute.xlu2 %2598  ;;  %v1333_v9 = vsel %vm278_vm1, %v1331_v19, %v1332_v10  ;;  %v1327_v1 = vsel %vm133_vm0, %v1325_v50, %v1326_v3  ;;  %v2817_v10 = vpack.i.bf16 %v1154_v15, %v3868_v32  ;;  %v1639_v15 = vsel %vm728_vm3, %v3644_v21, %v2591_v24 }
 0x217   :  { %v1757_v42 = vpack.c.bf16 %v1333_v9, %v1317_v7  ;;  %v2822_v29 = vpack.i.bf16 %v1327_v1, %v3919_v48  ;;  %v2601_v13 = vunpack.i.h.bf16 %v2599_v40  ;;  %v2600_v51 = vunpack.i.l.bf16 %v2599_v40 }
 0x218   :  { %v1638_v7 = vsel %vm728_vm3, %v3638_v17, %v2590_v6 }
 0x21b   :  { %2267 = vmatmul.msk.bf16.gmra.mxu1 %vm728_vm3, %v1754_v55  ;;  %2773 = vrot.lane.b32.xlu0 %v2772_v27, %s2865_s17 }
 0x21c   :  { %2793 = vrot.lane.b32.xlu1 %v2792_v30, %s2866_s22  ;;  %2783 = vrot.lane.b32.xlu2 %v2782_v56, %s2863_s15 }
 0x21e   :  { %v3907_v25 = vpop.permute.xlu2 %2623 }
 0x223   :  { %2788 = vrot.lane.b32.xlu0 %v2787_v18, %s2866_s22 }
 0x224   :  { %2808 = vrot.lane.b32.xlu1 %v2807_v22, %s2863_s15  ;;  %2798 = vrot.lane.b32.xlu2 %v2792_v30, %s2865_s17 }
 0x225   :  { %v2594_v11 = vpop.permute.xlu1 %2593 }
 0x226   :  { %v3914_v37 = vpop.permute.xlu2 %2628  ;;  %v2595_v50 = vunpack.i.l.bf16 %v2594_v11 }
 0x227   :  { %v2631_v17 = vunpack.i.h.bf16 %v3914_v37 }
 0x22b   :  { %2268 = vmatmul.msk.bf16.gmra.mxu1 %vm728_vm3, %v1757_v42  ;;  %2803 = vrot.lane.b32.xlu0 %v2802_v43, %s2865_s17  ;;  %v1654_v42 = vsel %vm762_vm5, %v1638_v7, %v2595_v50 }
 0x22c   :  { %2823 = vrot.lane.b32.xlu1 %v2822_v29, %s2866_s22  ;;  %2813 = vrot.lane.b32.xlu2 %v2812_v59, %s2863_s15 }
 0x22d   :  { %v2604_v49 = vpop.permute.xlu0 %2603 }
 0x22e   :  { %v2606_v55 = vunpack.i.h.bf16 %v2604_v49  ;;  %v2605_v27 = vunpack.i.l.bf16 %v2604_v49  ;;  %v2619_v30 = vpop.permute.xlu1 %2618  ;;  %v3927_v56 = vpop.permute.xlu2 %2648 }
 0x22f   :  { %v2621_v18 = vunpack.i.h.bf16 %v2619_v30  ;;  %v2620_v19 = vunpack.i.l.bf16 %v2619_v30 }
 0x230   :  { %v1687_v5 = vsel %vm728_vm3, %v3669_v63, %v2606_v55  ;;  %v1686_v4 = vsel %vm728_vm3, %v3653_v38, %v2605_v27  ;;  %v2596_v63 = vunpack.i.h.bf16 %v2594_v11 }
 0x231   :  { %v1702_v22 = vsel %vm762_vm5, %v1686_v4, %v2600_v51  ;;  %v1703_v47 = vsel %vm762_vm5, %v1687_v5, %v2601_v13  ;;  %v2630_v13 = vunpack.i.l.bf16 %v3914_v37 }
 0x232   :  { %v1718_v40 = vsel %vm796_vm7, %v1702_v22, %v2620_v19  ;;  %v1719_v14 = vsel %vm796_vm7, %v1703_v47, %v2621_v18  ;;  %v1655_v43 = vsel %vm762_vm5, %v1639_v15, %v2596_v63  ;;  %v2626_v22 = vunpack.i.h.bf16 %v3907_v25 }
 0x233   :  { %2818 = vrot.lane.b32.xlu0 %v2817_v10, %s2866_s22  ;;  %v1735_v38 = vpack.c.bf16 %v1719_v14, %v1718_v40  ;;  %v2625_v47 = vunpack.i.l.bf16 %v3907_v25 }
 0x234   :  { %v1641_v63 = vsel %vm728_vm3, %v3656_v62, %v2626_v22 }
 0x235   :  { %v2609_v3 = vpop.permute.xlu0 %2608  ;;  %1983 = vmatmul.bf16.vlgmr.msrb.gmra.mxu3 %v1735_v38  ;;  %v1640_v50 = vsel %vm728_vm3, %v3662_v41, %v2625_v47 }
 0x236   :  { %v2611_v9 = vunpack.i.h.bf16 %v2609_v3  ;;  %v2610_v1 = vunpack.i.l.bf16 %v2609_v3  ;;  %v2639_v0 = vpop.permute.xlu1 %2638  ;;  %v2664_v29 = vpop.permute.xlu2 %2663 }
 0x237   :  { %v2640_v40 = vunpack.i.l.bf16 %v2639_v0  ;;  %v2665_v41 = vunpack.i.l.bf16 %v2664_v29 }
 0x238   :  { %v1670_v11 = vsel %vm796_vm7, %v1654_v42, %v2610_v1  ;;  %v1671_v59 = vsel %vm796_vm7, %v1655_v43, %v2611_v9 }
 0x239   :  { %v1734_v49 = vpack.c.bf16 %v1671_v59, %v1670_v11  ;;  %v1656_v15 = vsel %vm762_vm5, %v1640_v50, %v2640_v40 }
 0x23b   :  { %1934 = vmatmul.bf16.vlgmr.msrb.gmra.mxu2 %v1734_v49  ;;  %v2666_v49 = vunpack.i.h.bf16 %v2664_v29 }
 0x23d   :  { %v2614_v55 = vpop.permute.xlu0 %2613 }
 0x23e   :  { %v2616_v27 = vunpack.i.h.bf16 %v2614_v55  ;;  %v2615_v21 = vunpack.i.l.bf16 %v2614_v55  ;;  %v2644_v30 = vpop.permute.xlu1 %2643  ;;  %v3959_v24 = vpop.permute.xlu2 %2678 }
 0x23f   :  { %v2646_v4 = vunpack.i.h.bf16 %v2644_v30  ;;  %v2645_v18 = vunpack.i.l.bf16 %v2644_v30 }
 0x240   :  { %v1689_v51 = vsel %vm728_vm3, %v3701_v12, %v2616_v27  ;;  %v1688_v5 = vsel %vm728_vm3, %v3672_v58, %v2615_v21  ;;  %v2641_v12 = vunpack.i.h.bf16 %v2639_v0 }
 0x241   :  { %v1704_v19 = vsel %vm762_vm5, %v1688_v5, %v2630_v13  ;;  %v1705_v10 = vsel %vm762_vm5, %v1689_v51, %v2631_v17  ;;  %v2651_v51 = vunpack.i.h.bf16 %v3927_v56  ;;  %v2650_v5 = vunpack.i.l.bf16 %v3927_v56 }
 0x242   :  { %v1720_v37 = vsel %vm796_vm7, %v1704_v19, %v2645_v18  ;;  %v1721_v6 = vsel %vm796_vm7, %v1705_v10, %v2646_v4  ;;  %v1657_v7 = vsel %vm762_vm5, %v1641_v63, %v2641_v12 }
 0x243   :  { %v1738_v14 = vpack.c.bf16 %v1721_v6, %v1720_v37  ;;  %v1642_v22 = vsel %vm728_vm3, %v3682_v2, %v2650_v5 }
 0x245   :  { %v2634_v58 = vpop.permute.xlu0 %2633  ;;  %1988 = vmatmul.bf16.gmra.mxu3 %v1738_v14 }
 0x246   :  { %v2636_v38 = vunpack.i.h.bf16 %v2634_v58  ;;  %v2635_v3 = vunpack.i.l.bf16 %v2634_v58  ;;  %v2659_v25 = vpop.permute.xlu1 %2658  ;;  %v2694_v42 = vpop.permute.xlu2 %2693 }
 0x247   :  { %v2661_v18 = vunpack.i.h.bf16 %v2659_v25  ;;  %v2660_v19 = vunpack.i.l.bf16 %v2659_v25  ;;  %v2696_v2 = vunpack.i.h.bf16 %v2694_v42  ;;  %v2695_v25 = vunpack.i.l.bf16 %v2694_v42 }
 0x248   :  { %v1672_v9 = vsel %vm796_vm7, %v1656_v15, %v2635_v3  ;;  %v1673_v1 = vsel %vm796_vm7, %v1657_v7, %v2636_v38 }
 0x249   :  { %v1737_v0 = vpack.c.bf16 %v1673_v1, %v1672_v9  ;;  %v1658_v12 = vsel %vm762_vm5, %v1642_v22, %v2660_v19 }
 0x24b   :  { %1939 = vmatmul.bf16.gmra.mxu2 %v1737_v0 }
 0x24d   :  { %v2654_v43 = vpop.permute.xlu0 %2653 }
 0x24e   :  { %v2656_v11 = vunpack.i.h.bf16 %v2654_v43  ;;  %v2655_v62 = vunpack.i.l.bf16 %v2654_v43  ;;  %v2674_v59 = vpop.permute.xlu1 %2673  ;;  %v3985_v47 = vpop.permute.xlu2 %2708 }
 0x24f   :  { %v2676_v21 = vunpack.i.h.bf16 %v2674_v59  ;;  %v2675_v30 = vunpack.i.l.bf16 %v2674_v59  ;;  %v2680_v59 = vunpack.i.l.bf16 %v3959_v24 }
 0x250   :  { %v1691_v55 = vsel %vm728_vm3, %v3730_v8, %v2656_v11  ;;  %v1690_v27 = vsel %vm728_vm3, %v3698_v45, %v2655_v62  ;;  %v1643_v45 = vsel %vm728_vm3, %v3684_v61, %v2651_v51  ;;  %v2681_v62 = vunpack.i.h.bf16 %v3959_v24 }
 0x251   :  { %v1706_v17 = vsel %vm762_vm5, %v1690_v27, %v2665_v41  ;;  %v1707_v13 = vsel %vm762_vm5, %v1691_v55, %v2666_v49  ;;  %v1659_v40 = vsel %vm762_vm5, %v1643_v45, %v2661_v18 }
 0x252   :  { %v1722_v4 = vsel %vm796_vm7, %v1706_v17, %v2675_v30  ;;  %v1723_v29 = vsel %vm796_vm7, %v1707_v13, %v2676_v21  ;;  %v1644_v21 = vsel %vm728_vm3, %v3711_v23, %v2680_v59 }
 0x253   :  { %v1741_v8 = vpack.c.bf16 %v1723_v29, %v1722_v4 }
 0x255   :  { %v2669_v10 = vpop.permute.xlu0 %2668  ;;  %1993 = vmatmul.bf16.gmra.mxu3 %v1741_v8 }
 0x256   :  { %v2671_v37 = vunpack.i.h.bf16 %v2669_v10  ;;  %v2670_v6 = vunpack.i.l.bf16 %v2669_v10  ;;  %v2689_v56 = vpop.permute.xlu1 %2688  ;;  %v2724_v15 = vpop.permute.xlu2 %2723 }
 0x257   :  { %v2691_v41 = vunpack.i.h.bf16 %v2689_v56  ;;  %v2690_v55 = vunpack.i.l.bf16 %v2689_v56  ;;  %v2726_v45 = vunpack.i.h.bf16 %v2724_v15  ;;  %v2725_v23 = vunpack.i.l.bf16 %v2724_v15 }
 0x258   :  { %v1674_v14 = vsel %vm796_vm7, %v1658_v12, %v2670_v6  ;;  %v1675_v58 = vsel %vm796_vm7, %v1659_v40, %v2671_v37 }
 0x259   :  { %v1740_v63 = vpack.c.bf16 %v1675_v58, %v1674_v14  ;;  %v1660_v24 = vsel %vm762_vm5, %v1644_v21, %v2690_v55  ;;  %v2711_v14 = vunpack.i.h.bf16 %v3985_v47  ;;  %v2710_v58 = vunpack.i.l.bf16 %v3985_v47 }
 0x25b   :  { %1944 = vmatmul.bf16.gmra.mxu2 %v1740_v63 }
 0x25d   :  { %v2684_v50 = vpop.permute.xlu0 %2683 }
 0x25e   :  { %v2686_v61 = vunpack.i.h.bf16 %v2684_v50  ;;  %v2685_v38 = vunpack.i.l.bf16 %v2684_v50  ;;  %v2704_v3 = vpop.permute.xlu1 %2703  ;;  %v2739_v18 = vpop.permute.xlu2 %2738 }
 0x25f   :  { %v2706_v1 = vunpack.i.h.bf16 %v2704_v3  ;;  %v2705_v0 = vunpack.i.l.bf16 %v2704_v3 }
 0x260   :  { %v1693_v7 = vsel %vm728_vm3, %v3753_v54, %v2686_v61  ;;  %v1692_v9 = vsel %vm728_vm3, %v3727_v60, %v2685_v38  ;;  %v1645_v60 = vsel %vm728_vm3, %v3713_v35, %v2681_v62 }
 0x261   :  { %v1708_v43 = vsel %vm762_vm5, %v1692_v9, %v2695_v25  ;;  %v1709_v11 = vsel %vm762_vm5, %v1693_v7, %v2696_v2  ;;  %v1661_v51 = vsel %vm762_vm5, %v1645_v60, %v2691_v41  ;;  %v1646_v25 = vsel %vm728_vm3, %v3748_v36, %v2710_v58 }
 0x262   :  { %v1724_v49 = vsel %vm796_vm7, %v1708_v43, %v2705_v0  ;;  %v1725_v42 = vsel %vm796_vm7, %v1709_v11, %v2706_v1 }
 0x263   :  { %v1744_v54 = vpack.c.bf16 %v1725_v42, %v1724_v49 }
 0x265   :  { %v2699_v27 = vpop.permute.xlu0 %2698  ;;  %1998 = vmatmul.bf16.gmra.mxu3 %v1744_v54 }
 0x266   :  { %v2701_v30 = vunpack.i.h.bf16 %v2699_v27  ;;  %v2700_v17 = vunpack.i.l.bf16 %v2699_v27  ;;  %v2719_v13 = vpop.permute.xlu1 %2718  ;;  %v2754_v3 = vpop.permute.xlu2 %2753 }
 0x267   :  { %v2721_v61 = vunpack.i.h.bf16 %v2719_v13  ;;  %v2720_v38 = vunpack.i.l.bf16 %v2719_v13  ;;  %v2756_v41 = vunpack.i.h.bf16 %v2754_v3  ;;  %v2755_v36 = vunpack.i.l.bf16 %v2754_v3 }
 0x268   :  { %v1676_v5 = vsel %vm796_vm7, %v1660_v24, %v2700_v17  ;;  %v1677_v4 = vsel %vm796_vm7, %v1661_v51, %v2701_v30  ;;  %v2741_v17 = vunpack.i.h.bf16 %v2739_v18  ;;  %v2740_v13 = vunpack.i.l.bf16 %v2739_v18 }
 0x269   :  { %v1743_v29 = vpack.c.bf16 %v1677_v4, %v1676_v5  ;;  %v1662_v47 = vsel %vm762_vm5, %v1646_v25, %v2720_v38 }
 0x26b   :  { %1949 = vmatmul.bf16.gmra.mxu2 %v1743_v29 }
 0x26d   :  { %v2714_v19 = vpop.permute.xlu0 %2713 }
 0x26e   :  { %v2716_v8 = vunpack.i.h.bf16 %v2714_v19  ;;  %v2715_v35 = vunpack.i.l.bf16 %v2714_v19  ;;  %v2734_v10 = vpop.permute.xlu1 %2733  ;;  %v2769_v59 = vpop.permute.xlu2 %2768 }
 0x26f   :  { %v2736_v6 = vunpack.i.h.bf16 %v2734_v10  ;;  %v2735_v56 = vunpack.i.l.bf16 %v2734_v10  ;;  %v2771_v3 = vunpack.i.h.bf16 %v2769_v59 }
 0x270   :  { %v1695_v22 = vsel %vm728_vm3, %v3801_v26, %v2716_v8  ;;  %v1694_v37 = vsel %vm728_vm3, %v3771_v28, %v2715_v35  ;;  %v1647_v28 = vsel %vm728_vm3, %v3756_v39, %v2711_v14 }
 0x271   :  { %v1710_v12 = vsel %vm762_vm5, %v1694_v37, %v2725_v23  ;;  %v1711_v40 = vsel %vm762_vm5, %v1695_v22, %v2726_v45  ;;  %v1663_v1 = vsel %vm762_vm5, %v1647_v28, %v2721_v61 }
 0x272   :  { %v1726_v63 = vsel %vm796_vm7, %v1710_v12, %v2735_v56  ;;  %v1727_v50 = vsel %vm796_vm7, %v1711_v40, %v2736_v6 }
 0x273   :  { %v1747_v26 = vpack.c.bf16 %v1727_v50, %v1726_v63 }
 0x275   :  { %v2729_v2 = vpop.permute.xlu0 %2728  ;;  %2003 = vmatmul.bf16.gmra.mxu3 %v1747_v26 }
 0x276   :  { %v2731_v15 = vunpack.i.h.bf16 %v2729_v2  ;;  %v2730_v7 = vunpack.i.l.bf16 %v2729_v2  ;;  %v2749_v9 = vpop.permute.xlu1 %2748  ;;  %v2784_v23 = vpop.permute.xlu2 %2783  ;;  %v2770_v2 = vunpack.i.l.bf16 %v2769_v59 }
 0x277   :  { %v2751_v5 = vunpack.i.h.bf16 %v2749_v9  ;;  %v2750_v4 = vunpack.i.l.bf16 %v2749_v9  ;;  %v2786_v14 = vunpack.i.h.bf16 %v2784_v23 }
 0x278   :  { %v1678_v0 = vsel %vm796_vm7, %v1662_v47, %v2730_v7  ;;  %v1679_v43 = vsel %vm796_vm7, %v1663_v1, %v2731_v15  ;;  %v1650_v1 = vsel %vm728_vm3, %v3814_v33, %v2770_v2 }
 0x279   :  { %v1746_v11 = vpack.c.bf16 %v1679_v43, %v1678_v0 }
 0x27b   :  { %1954 = vmatmul.bf16.gmra.mxu2 %v1746_v11 }
 0x27d   :  { %v2744_v62 = vpop.permute.xlu0 %2743 }
 0x27e   :  { %v2746_v49 = vunpack.i.h.bf16 %v2744_v62  ;;  %v2745_v39 = vunpack.i.l.bf16 %v2744_v62  ;;  %v2764_v42 = vpop.permute.xlu1 %2763  ;;  %v2799_v28 = vpop.permute.xlu2 %2798 }
 0x27f   :  { %v2766_v27 = vunpack.i.h.bf16 %v2764_v42  ;;  %v2765_v60 = vunpack.i.l.bf16 %v2764_v42 }
 0x280   :  { %v1697_v55 = vsel %vm728_vm3, %v3848_v16, %v2746_v49  ;;  %v1696_v54 = vsel %vm728_vm3, %v3792_v31, %v2745_v39  ;;  %v1649_v31 = vsel %vm728_vm3, %v3775_v57, %v2741_v17  ;;  %v1648_v16 = vsel %vm728_vm3, %v3773_v46, %v2740_v13 }
 0x281   :  { %v1712_v21 = vsel %vm762_vm5, %v1696_v54, %v2755_v36  ;;  %v1713_v30 = vsel %vm762_vm5, %v1697_v55, %v2756_v41  ;;  %v1664_v18 = vsel %vm762_vm5, %v1648_v16, %v2750_v4  ;;  %v1665_v45 = vsel %vm762_vm5, %v1649_v31, %v2751_v5 }
 0x282   :  { %v1728_v24 = vsel %vm796_vm7, %v1712_v21, %v2765_v60  ;;  %v1729_v51 = vsel %vm796_vm7, %v1713_v30, %v2766_v27  ;;  %v2785_v46 = vunpack.i.l.bf16 %v2784_v23  ;;  %v2801_v5 = vunpack.i.h.bf16 %v2799_v28 }
 0x283   :  { %v1750_v29 = vpack.c.bf16 %v1729_v51, %v1728_v24  ;;  %v2033_v51 = vpop.f32.mrf.mxu1  ;;  %v2800_v4 = vunpack.i.l.bf16 %v2799_v28 }
 0x285   :  { %v2759_v19 = vpop.permute.xlu0 %2758  ;;  %2008 = vmatmul.bf16.gmra.mxu3 %v1750_v29 }
 0x286   :  { %v2761_v8 = vunpack.i.h.bf16 %v2759_v19  ;;  %v2760_v35 = vunpack.i.l.bf16 %v2759_v19  ;;  %v2779_v10 = vpop.permute.xlu1 %2778  ;;  %v2814_v41 = vpop.permute.xlu2 %2813 }
 0x287   :  { %v2781_v7 = vunpack.i.h.bf16 %v2779_v10  ;;  %v2780_v9 = vunpack.i.l.bf16 %v2779_v10  ;;  %v2816_v27 = vunpack.i.h.bf16 %v2814_v41  ;;  %v2815_v33 = vunpack.i.l.bf16 %v2814_v41 }
 0x288   :  { %v1680_v22 = vsel %vm796_vm7, %v1664_v18, %v2760_v35  ;;  %v1681_v37 = vsel %vm796_vm7, %v1665_v45, %v2761_v8  ;;  %v1652_v35 = vsel %vm728_vm3, %v3866_v44, %v2800_v4  ;;  %v2829_v44 = vld [vmem:[%s4272_s0 + $0x18] sm:$0x3] }
 0x289   :  { %v1749_v6 = vpack.c.bf16 %v1681_v37, %v1680_v22  ;;  %v1666_v62 = vsel %vm762_vm5, %v1650_v1, %v2780_v9 }
 0x28b   :  { %1959 = vmatmul.bf16.gmra.mxu2 %v1749_v6 }
 0x28d   :  { %v2774_v56 = vpop.permute.xlu0 %2773 }
 0x28e   :  { %v2776_v12 = vunpack.i.h.bf16 %v2774_v56  ;;  %v2775_v57 = vunpack.i.l.bf16 %v2774_v56  ;;  %v2794_v40 = vpop.permute.xlu1 %2793  ;;  %v2035_v56 = vpop.f32.mrf.mxu1 }
 0x28f   :  { %v2796_v50 = vunpack.i.h.bf16 %v2794_v40  ;;  %v2795_v61 = vunpack.i.l.bf16 %v2794_v40 }
 0x290   :  { %v1699_v58 = vsel %vm728_vm3, %v3897_v53, %v2776_v12  ;;  %v1698_v63 = vsel %vm728_vm3, %v3839_v20, %v2775_v57  ;;  %v1651_v20 = vsel %vm728_vm3, %v3816_v34, %v2771_v3 }
 0x291   :  { %v1714_v38 = vsel %vm762_vm5, %v1698_v63, %v2785_v46  ;;  %v1715_v26 = vsel %vm762_vm5, %v1699_v58, %v2786_v14  ;;  %v1667_v59 = vsel %vm762_vm5, %v1651_v20, %v2781_v7  ;;  %v135_v14 = vrot.slane %v2829_v44, 1  ;;  %v2830_v58 = vld [vmem:[%s4272_s0 + $0x10] sm:$0xff]  ;;  %v2831_v7 = vld [vmem:[%s4272_s0 + $0x20] sm:$0xff] }
 0x292   :  { %v1730_v25 = vsel %vm796_vm7, %v1714_v38, %v2795_v61  ;;  %v1731_v15 = vsel %vm796_vm7, %v1715_v26, %v2796_v50  ;;  %v134_v63 = vrot.slane %v2830_v58, 1  ;;  %v4084_v38 = vld [vmem:[%s4276_s4] ss:$0 sm:$0xff]  ;;  %v137_v9 = vrot.slane %v2831_v7, 1 }
 0x293   :  { %v1753_v47 = vpack.c.bf16 %v1731_v15, %v1730_v25 }
 0x294   :  { %v136_v3 = vsel %vm133_vm0, %v134_v63, %v135_v14  ;;  %v2840_v63 = vld [vmem:[%s4272_s0 + $0x68] sm:$0x3] }
 0x295   :  { %v2789_v53 = vpop.permute.xlu0 %2788  ;;  %2013 = vmatmul.bf16.gmra.mxu3 %v1753_v47  ;;  %v2832_v47 = vld [vmem:[%s4272_s0 + $0x28] sm:$0x3] }
 0x296   :  { %v2791_v0 = vunpack.i.h.bf16 %v2789_v53  ;;  %v2790_v43 = vunpack.i.l.bf16 %v2789_v53  ;;  %v2809_v11 = vpop.permute.xlu1 %2808  ;;  %v2038_v12 = vpop.f32.mrf.mxu1  ;;  %v138_v53 = vrot.slane %v2832_v47, 1 }
 0x297   :  { %v2811_v31 = vunpack.i.h.bf16 %v2809_v11  ;;  %v2810_v16 = vunpack.i.l.bf16 %v2809_v11 }
 0x298   :  { %v1682_v49 = vsel %vm796_vm7, %v1666_v62, %v2790_v43  ;;  %v1683_v39 = vsel %vm796_vm7, %v1667_v59, %v2791_v0  ;;  %v139_v11 = vsel %vm133_vm0, %v137_v9, %v138_v53  ;;  %v2841_v9 = vld [vmem:[%s4272_s0 + $0x70] sm:$0xff]  ;;  %v2842_v53 = vld [vmem:[%s4272_s0 + $0x78] sm:$0x3] }
 0x299   :  { %v1752_v42 = vpack.c.bf16 %v1683_v39, %v1682_v49  ;;  %v1668_v45 = vsel %vm762_vm5, %v1652_v35, %v2810_v16  ;;  %v152_v47 = vrot.slane %v2841_v9, 1 }
 0x29b   :  { %1964 = vmatmul.bf16.gmra.mxu2 %v1752_v42  ;;  %v2833_v42 = vld [vmem:[%s4272_s0 + $0x30] sm:$0xff] }
 0x29c   :  { %v140_v41 = vrot.slane %v2833_v42, 1 }
 0x29d   :  { %v2804_v36 = vpop.permute.xlu0 %2803 }
 0x29e   :  { %v2806_v55 = vunpack.i.h.bf16 %v2804_v36  ;;  %v2805_v34 = vunpack.i.l.bf16 %v2804_v36  ;;  %v2824_v54 = vpop.permute.xlu1 %2823  ;;  %v2040_v46 = vpop.f32.mrf.mxu1  ;;  %v2834_v36 = vld [vmem:[%s4272_s0 + $0x38] sm:$0x3] }
 0x29f   :  { %v2826_v30 = vunpack.i.h.bf16 %v2824_v54  ;;  %v2825_v17 = vunpack.i.l.bf16 %v2824_v54 }
 0x2a0   :  { %v1701_v60 = vsel %vm728_vm3, %v3919_v48, %v2806_v55  ;;  %v1700_v21 = vsel %vm728_vm3, %v3891_v52, %v2805_v34  ;;  %v1653_v52 = vsel %vm728_vm3, %v3868_v32, %v2801_v5  ;;  %v141_v55 = vrot.slane %v2834_v36, 1  ;;  %v2836_v5 = vld [vmem:[%s4272_s0 + $0x48] sm:$0x3] }
 0x2a1   :  { %v1716_v13 = vsel %vm762_vm5, %v1700_v21, %v2815_v33  ;;  %v1717_v24 = vsel %vm762_vm5, %v1701_v60, %v2816_v27  ;;  %v1669_v23 = vsel %vm762_vm5, %v1653_v52, %v2811_v31  ;;  %v144_v4 = vrot.slane %v2836_v5, 1 }
 0x2a2   :  { %v1732_v29 = vsel %vm796_vm7, %v1716_v13, %v2825_v17  ;;  %v1733_v19 = vsel %vm796_vm7, %v1717_v24, %v2826_v30  ;;  %v142_v60 = vsel %vm133_vm0, %v140_v41, %v141_v55  ;;  %v2835_v24 = vld [vmem:[%s4272_s0 + $0x40] sm:$0xff]  ;;  %v2844_v55 = vld [vmem:[%s4272_s0 + $0x88] sm:$0x3] }
 0x2a3   :  { %v1756_v8 = vpack.c.bf16 %v1733_v19, %v1732_v29  ;;  %v2843_v41 = vld [vmem:[%s4272_s0 + $0x80] sm:$0xff] }
 0x2a4   :  { %v155_v36 = vrot.slane %v2843_v41, 1 }
 0x2a5   :  { %v2819_v48 = vpop.permute.xlu0 %2818  ;;  %2018 = vmatmul.bf16.gmra.mxu3 %v1756_v8 }
 0x2a6   :  { %v2821_v10 = vunpack.i.h.bf16 %v2819_v48  ;;  %v2820_v18 = vunpack.i.l.bf16 %v2819_v48  ;;  %v2043_v0 = vpop.f32.mrf.mxu1 }
 0x2a8   :  { %v1684_v22 = vsel %vm796_vm7, %v1668_v45, %v2820_v18  ;;  %v1685_v37 = vsel %vm796_vm7, %v1669_v23, %v2821_v10  ;;  %v2837_v18 = vld [vmem:[%s4272_s0 + $0x50] sm:$0xff]  ;;  %v2838_v23 = vld [vmem:[%s4272_s0 + $0x58] sm:$0x3] }
 0x2a9   :  { %v1755_v6 = vpack.c.bf16 %v1685_v37, %v1684_v22  ;;  %v146_v45 = vrot.slane %v2837_v18, 1  ;;  %v147_v22 = vrot.slane %v2838_v23, 1 }
 0x2ab   :  { %1969 = vmatmul.bf16.gmra.mxu2 %v1755_v6 }
 0x2ae   :  { %v2045_v33 = vpop.f32.mrf.mxu1 }
 0x2b6   :  { %v2048_v48 = vpop.f32.mrf.mxu1 }
 0x2b8   :  { %v1984_v57 = vpop.f32.mrf.mxu3 }
 0x2be   :  { %v1935_v40 = vpop.f32.mrf.mxu2  ;;  %v2050_v14 = vpop.f32.mrf.mxu1 }
 0x2bf   :  { %v1985_v32 = vadd.f32 %v1984_v57, %v1935_v40 }
 0x2c0   :  { %v1986_v50 = vpop.f32.mrf.mxu3 }
 0x2c1   :  { %v2034_v61 = vadd.f32 %v2033_v51, %v1985_v32  ;;  %v143_v51 = vrot.slane %v2835_v24, 1 }
 0x2c3   :  { %v2073_v26 = vmul.f32 0.5, %v2034_v61  ;;  %v145_v16 = vsel %vm133_vm0, %v143_v51, %v144_v4  ;;  %v2845_v51 = vld [vmem:[%s4272_s0 + $0xb0] sm:$0xff]  ;;  %v2846_v4 = vld [vmem:[%s4272_s0 + $0xb8] sm:$0x3] }
 0x2c4   :  { %v158_v5 = vrot.slane %v2845_v51, 1 }
 0x2c5   :  { %v2093_v2 = vadd.f32 %v4084_v38, %v2073_v26 }
 0x2c6   :  { %v1937_v28 = vpop.f32.mrf.mxu2 }
 0x2c7   :  { %v2109_v25 = vadd.f32 %v2093_v2, %v136_v3  ;;  %v1987_v15 = vadd.f32 %v1986_v50, %v1937_v28  ;;  %v150_v50 = vrot.slane %v2840_v63, 1 }
 0x2c8   :  { %v1989_v20 = vpop.f32.mrf.mxu3 }
 0x2c9   :  { %2125 = vst.msk [vmem:[%s4277_s5] sm:$0xff] %vm711_vm2, %v2109_v25  ;;  %v2036_v1 = vadd.f32 %v2035_v56, %v1987_v15 }
 0x2cb   :  { %v2074_v43 = vmul.f32 0.5, %v2036_v1 }
 0x2cd   :  { %v2094_v62 = vadd.f32 %v4084_v38, %v2074_v43  ;;  %v2053_v43 = vpop.f32.mrf.mxu1 }
 0x2ce   :  { %v1940_v59 = vpop.f32.mrf.mxu2 }
 0x2cf   :  { %v2110_v49 = vadd.f32 %v2094_v62, %v139_v11  ;;  %v1990_v39 = vadd.f32 %v1989_v20, %v1940_v59  ;;  %v153_v20 = vrot.slane %v2842_v53, 1 }
 0x2d0   :  { %v1991_v34 = vpop.f32.mrf.mxu3 }
 0x2d1   :  { %2126 = vst.msk [vmem:[%s4277_s5 + $0x8] sm:$0xff] %vm711_vm2, %v2110_v49  ;;  %v2039_v54 = vadd.f32 %v2038_v12, %v1990_v39  ;;  %v148_v12 = vsel %vm133_vm0, %v146_v45, %v147_v22  ;;  %v154_v62 = vsel %vm133_vm0, %v152_v47, %v153_v20  ;;  %v2847_v45 = vld [vmem:[%s4272_s0 + $0xc0] sm:$0xff]  ;;  %v2848_v22 = vld [vmem:[%s4272_s0 + $0xc8] sm:$0x3] }
 0x2d2   :  { %v161_v23 = vrot.slane %v2847_v45, 1  ;;  %v2851_v47 = vld [vmem:[%s4272_s0 + $0xe0] sm:$0xff]  ;;  %v2852_v20 = vld [vmem:[%s4272_s0 + $0xe8] sm:$0x3] }
 0x2d3   :  { %v2075_v27 = vmul.f32 0.5, %v2039_v54  ;;  %v167_v53 = vrot.slane %v2851_v47, 1 }
 0x2d5   :  { %v2095_v21 = vadd.f32 %v4084_v38, %v2075_v27 }
 0x2d6   :  { %v1942_v30 = vpop.f32.mrf.mxu2 }
 0x2d7   :  { %v2111_v17 = vadd.f32 %v2095_v21, %v142_v60  ;;  %v1992_v13 = vadd.f32 %v1991_v34, %v1942_v30  ;;  %v156_v34 = vrot.slane %v2844_v55, 1  ;;  %v2055_v60 = vpop.f32.mrf.mxu1 }
 0x2d8   :  { %v1994_v29 = vpop.f32.mrf.mxu3 }
 0x2d9   :  { %2127 = vst.msk [vmem:[%s4277_s5 + $0x10] sm:$0xff] %vm711_vm2, %v2111_v17  ;;  %v2041_v19 = vadd.f32 %v2040_v46, %v1992_v13  ;;  %v2839_v46 = vld [vmem:[%s4272_s0 + $0x60] sm:$0xff]  ;;  %v157_v21 = vsel %vm133_vm0, %v155_v36, %v156_v34  ;;  %v2853_v36 = vld [vmem:[%s4272_s0 + $0xf0] sm:$0xff]  ;;  %v2854_v34 = vld [vmem:[%s4272_s0 + $0xf8] sm:$0x3] }
 0x2da   :  { %v149_v58 = vrot.slane %v2839_v46, 1  ;;  %v170_v55 = vrot.slane %v2853_v36, 1 }
 0x2db   :  { %v2076_v31 = vmul.f32 0.5, %v2041_v19 }
 0x2dc   :  { %v151_v2 = vsel %vm133_vm0, %v149_v58, %v150_v50  ;;  %v2849_v58 = vld [vmem:[%s4272_s0 + $0xd0] sm:$0xff]  ;;  %v2850_v50 = vld [vmem:[%s4272_s0 + $0xd8] sm:$0x3] }
 0x2dd   :  { %v2096_v8 = vadd.f32 %v4084_v38, %v2076_v31  ;;  %v164_v63 = vrot.slane %v2849_v58, 1 }
 0x2de   :  { %v1945_v52 = vpop.f32.mrf.mxu2 }
 0x2df   :  { %v2112_v35 = vadd.f32 %v2096_v8, %v145_v16  ;;  %v1995_v10 = vadd.f32 %v1994_v29, %v1945_v52  ;;  %v159_v29 = vrot.slane %v2846_v4, 1  ;;  %v2058_v52 = vpop.f32.mrf.mxu1 }
 0x2e0   :  { %v1996_v37 = vpop.f32.mrf.mxu3 }
 0x2e1   :  { %2128 = vst.msk [vmem:[%s4277_s5 + $0x18] sm:$0xff] %vm711_vm2, %v2112_v35  ;;  %v2044_v6 = vadd.f32 %v2043_v0, %v1995_v10  ;;  %v160_v8 = vsel %vm133_vm0, %v158_v5, %v159_v29  ;;  %v2855_v5 = vld [vmem:[%s4272_s0 + $0x100] sm:$0xff]  ;;  %v2856_v29 = vld [vmem:[%s4272_s0 + $0x108] sm:$0x3] }
 0x2e2   :  { %v173_v4 = vrot.slane %v2855_v5, 1 }
 0x2e3   :  { %v2077_v56 = vmul.f32 0.5, %v2044_v6 }
 0x2e5   :  { %v2097_v57 = vadd.f32 %v4084_v38, %v2077_v56 }
 0x2e6   :  { %v1947_v40 = vpop.f32.mrf.mxu2 }
 0x2e7   :  { %v2113_v32 = vadd.f32 %v2097_v57, %v148_v12  ;;  %v1997_v44 = vadd.f32 %v1996_v37, %v1947_v40  ;;  %v162_v37 = vrot.slane %v2848_v22, 1  ;;  %v2060_v46 = vpop.f32.mrf.mxu1 }
 0x2e8   :  { %v1999_v61 = vpop.f32.mrf.mxu3 }
 0x2e9   :  { %2129 = vst.msk [vmem:[%s4277_s5 + $0x20] sm:$0xff] %vm711_vm2, %v2113_v32  ;;  %v2046_v26 = vadd.f32 %v2045_v33, %v1997_v44  ;;  %v163_v57 = vsel %vm133_vm0, %v161_v23, %v162_v37  ;;  %v2857_v23 = vld [vmem:[%s4272_s0 + $0x110] sm:$0xff]  ;;  %v2858_v37 = vld [vmem:[%s4272_s0 + $0x118] sm:$0x3] }
 0x2ea   :  { %v176_v22 = vrot.slane %v2857_v23, 1 }
 0x2eb   :  { %v2078_v3 = vmul.f32 0.5, %v2046_v26 }
 0x2ed   :  { %v2098_v28 = vadd.f32 %v4084_v38, %v2078_v3 }
 0x2ee   :  { %v1950_v25 = vpop.f32.mrf.mxu2 }
 0x2ef   :  { %v2114_v15 = vadd.f32 %v2098_v28, %v151_v2  ;;  %v2000_v7 = vadd.f32 %v1999_v61, %v1950_v25  ;;  %v165_v61 = vrot.slane %v2850_v50, 1 }
 0x2f0   :  { %v2001_v1 = vpop.f32.mrf.mxu3 }
 0x2f1   :  { %2130 = vst.msk [vmem:[%s4277_s5 + $0x28] sm:$0xff] %vm711_vm2, %v2114_v15  ;;  %v2049_v0 = vadd.f32 %v2048_v48, %v2000_v7  ;;  %v166_v28 = vsel %vm133_vm0, %v164_v63, %v165_v61  ;;  %v2859_v63 = vld [vmem:[%s4272_s0 + $0x120] sm:$0xff]  ;;  %v2860_v61 = vld [vmem:[%s4272_s0 + $0x128] sm:$0x3] }
 0x2f2   :  { %v179_v50 = vrot.slane %v2859_v63, 1 }
 0x2f3   :  { %v2079_v11 = vmul.f32 0.5, %v2049_v0 }
 0x2f5   :  { %v2099_v59 = vadd.f32 %v4084_v38, %v2079_v11  ;;  %v2063_v11 = vpop.f32.mrf.mxu1 }
 0x2f6   :  { %v1952_v49 = vpop.f32.mrf.mxu2 }
 0x2f7   :  { %v2115_v39 = vadd.f32 %v2099_v59, %v154_v62  ;;  %v2002_v42 = vadd.f32 %v2001_v1, %v1952_v49  ;;  %v168_v1 = vrot.slane %v2852_v20, 1 }
 0x2f8   :  { %v2004_v54 = vpop.f32.mrf.mxu3 }
 0x2f9   :  { %2131 = vst.msk [vmem:[%s4277_s5 + $0x30] sm:$0xff] %vm711_vm2, %v2115_v39  ;;  %v2051_v27 = vadd.f32 %v2050_v14, %v2002_v42  ;;  %v169_v59 = vsel %vm133_vm0, %v167_v53, %v168_v1 }
 0x2fb   :  { %v2080_v33 = vmul.f32 0.5, %v2051_v27 }
 0x2fd   :  { %v2100_v30 = vadd.f32 %v4084_v38, %v2080_v33 }
 0x2fe   :  { %v1955_v17 = vpop.f32.mrf.mxu2 }
 0x2ff   :  { %v2116_v13 = vadd.f32 %v2100_v30, %v157_v21  ;;  %v2005_v24 = vadd.f32 %v2004_v54, %v1955_v17  ;;  %v171_v54 = vrot.slane %v2854_v34, 1  ;;  %v2065_v21 = vpop.f32.mrf.mxu1 }
 0x300   :  { %v2006_v19 = vpop.f32.mrf.mxu3 }
 0x301   :  { %2132 = vst.msk [vmem:[%s4277_s5 + $0x38] sm:$0xff] %vm711_vm2, %v2116_v13  ;;  %v2054_v31 = vadd.f32 %v2053_v43, %v2005_v24  ;;  %v172_v30 = vsel %vm133_vm0, %v170_v55, %v171_v54 }
 0x303   :  { %v2081_v16 = vmul.f32 0.5, %v2054_v31 }
 0x305   :  { %v2101_v48 = vadd.f32 %v4084_v38, %v2081_v16 }
 0x306   :  { %v1957_v35 = vpop.f32.mrf.mxu2 }
 0x307   :  { %v2117_v10 = vadd.f32 %v2101_v48, %v160_v8  ;;  %v2007_v18 = vadd.f32 %v2006_v19, %v1957_v35  ;;  %v174_v19 = vrot.slane %v2856_v29, 1  ;;  %v2068_v35 = vpop.f32.mrf.mxu1 }
 0x308   :  { %v2009_v6 = vpop.f32.mrf.mxu3 }
 0x309   :  { %2133 = vst.msk [vmem:[%s4277_s5 + $0x40] sm:$0xff] %vm711_vm2, %v2117_v10  ;;  %v2056_v56 = vadd.f32 %v2055_v60, %v2007_v18  ;;  %v175_v8 = vsel %vm133_vm0, %v173_v4, %v174_v19 }
 0x30b   :  { %v2082_v12 = vmul.f32 0.5, %v2056_v56 }
 0x30d   :  { %v2102_v40 = vadd.f32 %v4084_v38, %v2082_v12 }
 0x30e   :  { %v1960_v32 = vpop.f32.mrf.mxu2 }
 0x30f   :  { %v2118_v44 = vadd.f32 %v2102_v40, %v163_v57  ;;  %v2010_v14 = vadd.f32 %v2009_v6, %v1960_v32  ;;  %v177_v6 = vrot.slane %v2858_v37, 1  ;;  %v2070_v58 = vpop.f32.mrf.mxu1 }
 0x310   :  { %v2011_v26 = vpop.f32.mrf.mxu3 }
 0x311   :  { %2134 = vst.msk [vmem:[%s4277_s5 + $0x48] sm:$0xff] %vm711_vm2, %v2118_v44  ;;  %v2059_v3 = vadd.f32 %v2058_v52, %v2010_v14  ;;  %v178_v57 = vsel %vm133_vm0, %v176_v22, %v177_v6 }
 0x313   :  { %v2083_v2 = vmul.f32 0.5, %v2059_v3 }
 0x315   :  { %v2103_v25 = vadd.f32 %v4084_v38, %v2083_v2 }
 0x316   :  { %v1962_v15 = vpop.f32.mrf.mxu2 }
 0x317   :  { %v2119_v7 = vadd.f32 %v2103_v25, %v166_v28  ;;  %v2012_v9 = vadd.f32 %v2011_v26, %v1962_v15  ;;  %v180_v26 = vrot.slane %v2860_v61, 1 }
 0x318   :  { %v2014_v0 = vpop.f32.mrf.mxu3 }
 0x319   :  { %2135 = vst.msk [vmem:[%s4277_s5 + $0x50] sm:$0xff] %vm711_vm2, %v2119_v7  ;;  %v2061_v43 = vadd.f32 %v2060_v46, %v2012_v9  ;;  %v181_v28 = vsel %vm133_vm0, %v179_v50, %v180_v26 }
 0x31b   :  { %v2084_v62 = vmul.f32 0.5, %v2061_v43 }
 0x31d   :  { %v2104_v49 = vadd.f32 %v4084_v38, %v2084_v62 }
 0x31e   :  { %v1965_v39 = vpop.f32.mrf.mxu2 }
 0x31f   :  { %v2120_v42 = vadd.f32 %v2104_v49, %v169_v59  ;;  %v2015_v41 = vadd.f32 %v2014_v0, %v1965_v39 }
 0x320   :  { %v2016_v33 = vpop.f32.mrf.mxu3 }
 0x321   :  { %2136 = vst.msk [vmem:[%s4277_s5 + $0x58] sm:$0xff] %vm711_vm2, %v2120_v42  ;;  %v2064_v27 = vadd.f32 %v2063_v11, %v2015_v41 }
 0x323   :  { %v2085_v60 = vmul.f32 0.5, %v2064_v27 }
 0x325   :  { %v2105_v17 = vadd.f32 %v4084_v38, %v2085_v60 }
 0x326   :  { %v1967_v13 = vpop.f32.mrf.mxu2 }
 0x327   :  { %v2121_v24 = vadd.f32 %v2105_v17, %v172_v30  ;;  %v2017_v51 = vadd.f32 %v2016_v33, %v1967_v13 }
 0x328   :  { %v2019_v48 = vpop.f32.mrf.mxu3 }
 0x329   :  { %2137 = vst.msk [vmem:[%s4277_s5 + $0x60] sm:$0xff] %vm711_vm2, %v2121_v24  ;;  %v2066_v31 = vadd.f32 %v2065_v21, %v2017_v51 }
 0x32b   :  { %v2086_v16 = vmul.f32 0.5, %v2066_v31 }
 0x32d   :  { %v2106_v52 = vadd.f32 %v4084_v38, %v2086_v16 }
 0x32e   :  { %v1970_v10 = vpop.f32.mrf.mxu2 }
 0x32f   :  { %v2122_v18 = vadd.f32 %v2106_v52, %v175_v8  ;;  %v2020_v45 = vadd.f32 %v2019_v48, %v1970_v10 }
 0x330   :  { %v2021_v32 = vpop.f32.mrf.mxu3 }
 0x331   :  { %2138 = vst.msk [vmem:[%s4277_s5 + $0x68] sm:$0xff] %vm711_vm2, %v2122_v18  ;;  %v2069_v56 = vadd.f32 %v2068_v35, %v2020_v45 }
 0x333   :  { %v2087_v12 = vmul.f32 0.5, %v2069_v56 }
 0x335   :  { %v2107_v40 = vadd.f32 %v4084_v38, %v2087_v12 }
 0x336   :  { %v1972_v44 = vpop.f32.mrf.mxu2 }
 0x337   :  { %v2123_v14 = vadd.f32 %v2107_v40, %v178_v57  ;;  %v2022_v46 = vadd.f32 %v2021_v32, %v1972_v44 }
 0x339   :  { %2139 = vst.msk [vmem:[%s4277_s5 + $0x70] sm:$0xff] %vm711_vm2, %v2123_v14  ;;  %v2071_v3 = vadd.f32 %v2070_v58, %v2022_v46 }
 0x33b   :  { %v2088_v2 = vmul.f32 0.5, %v2071_v3 }
 0x33d   :  { %v2108_v25 = vadd.f32 %v4084_v38, %v2088_v2 }
 0x33f   :  { %v2124_v15 = vadd.f32 %v2108_v25, %v181_v28 }
 0x341   :  { %2140 = vst.msk [vmem:[%s4277_s5 + $0x78] sm:$0xff] %vm711_vm2, %v2124_v15 }

</bundles_post_ra>
